<compile_context>
chip_gen: v7x
topology: tpu7x:2x2x1
jax: 0.10.0
libtpu: 0.0.40
codegen_flags: <defaults>
</compile_context>

<pallas_src>
import jax
import jax.numpy as jnp
from jax.experimental import pallas as pl
from jax.experimental.pallas import tpu as pltpu


# ----------------------------------------------------------------------------
# Kernel
# ----------------------------------------------------------------------------
def make_basenet_kernel(D, skips, neg_slope=0.01):
    """Fused-MLP kernel for a fixed depth / skip configuration.

    Activations are [channels, tm] (points on the lane axis).  Parameter refs
    per layer: (Wx^T, Wh^T, b) for skip layers, (W^T, b) otherwise, followed by
    (Wf^T, bf) for encoding_final and (Wo^T, bo) for out_layer.
    """
    skips = tuple(skips)

    def kernel(x_ref, *refs):
        out_ref = refs[-1]
        prefs = refs[:-1]

        x = x_ref[...]                         # [in_c, tm] f32
        x_bf = x.astype(jnp.bfloat16)          # MXU operand for skip layers
        h = x                                  # f32 activations
        idx = 0

        # encoding1 .. encodingD : Linear + LeakyReLU(0.01)
        for i in range(D):
            if i in skips:
                wx = prefs[idx][...]           # [W, in_c]  bf16
                wh = prefs[idx + 1][...]       # [W, W]     bf16
                b = prefs[idx + 2][...]        # [W, 1]     f32
                idx += 3
                z = (jnp.dot(wx, x_bf, preferred_element_type=jnp.float32)
                     + jnp.dot(wh, h.astype(jnp.bfloat16),
                               preferred_element_type=jnp.float32)
                     + b)
            else:
                w = prefs[idx][...]            # [W, fan_in] bf16
                b = prefs[idx + 1][...]        # [W, 1]      f32
                idx += 2
                z = jnp.dot(w, h.astype(jnp.bfloat16),
                            preferred_element_type=jnp.float32) + b
            h = jnp.where(z > 0, z, neg_slope * z)   # leaky_relu (f32)

        # encoding_final : Linear (no activation)
        wf = prefs[idx][...]
        bf = prefs[idx + 1][...]
        idx += 2
        h = jnp.dot(wf, h.astype(jnp.bfloat16),
                    preferred_element_type=jnp.float32) + bf

        # out_layer : Linear + Sigmoid
        wo = prefs[idx][...]
        bo = prefs[idx + 1][...]
        z = jnp.dot(wo, h.astype(jnp.bfloat16),
                    preferred_element_type=jnp.float32) + bo
        out_ref[...] = jax.nn.sigmoid(z).astype(out_ref.dtype)

    return kernel


# ----------------------------------------------------------------------------
# Wrapper
# ----------------------------------------------------------------------------
def _prep_params(params, D, skips, in_channels):
    """Transpose / split / cast the (W, b) pairs for the transposed kernel."""
    skips = tuple(skips)
    flat = []
    for i, (w, b) in enumerate(params):
        wt = jnp.asarray(w, jnp.float32).T                      # [fan_out, fan_in]
        if i < D and i in skips:
            # fan_in = in_c + W; concat order in the reference is [input_x, h]
            flat.append(wt[:, :in_channels].astype(jnp.bfloat16))   # Wx^T
            flat.append(wt[:, in_channels:].astype(jnp.bfloat16))   # Wh^T
        else:
            flat.append(wt.astype(jnp.bfloat16))
        flat.append(jnp.asarray(b, jnp.float32).reshape(-1, 1))     # [fan_out, 1]
    return flat


def basenet_forward(x, params, *, D, skips, tm=1024):
    """x: [N, in_channels] f32.  params: list of (W[fan_in,fan_out], b[fan_out])."""
    N, in_c = x.shape
    out_c = params[-1][0].shape[1]

    n_tiles = pl.cdiv(N, tm)
    n_pad = n_tiles * tm
    if n_pad != N:
        x = jnp.pad(x, ((0, n_pad - N), (0, 0)))
    # Layout plumbing: present points on the lane axis.
    x_t = x.astype(jnp.float32).T                                # [in_c, n_pad]

    flat = _prep_params(params, D, skips, in_c)

    in_specs = [pl.BlockSpec((in_c, tm), lambda i: (0, i))]
    for p in flat:
        # Small parameter arrays, fully resident every grid step.
        in_specs.append(pl.BlockSpec(p.shape, lambda i: (0, 0)))

    kernel = make_basenet_kernel(D, skips)

    out_t = pl.pallas_call(
        kernel,
        out_shape=jax.ShapeDtypeStruct((out_c, n_pad), jnp.float32),
        grid_spec=pltpu.PrefetchScalarGridSpec(
            num_scalar_prefetch=0,
            grid=(n_tiles,),
            in_specs=in_specs,
            out_specs=pl.BlockSpec((out_c, tm), lambda i: (0, i)),
        ),
        compiler_params=pltpu.CompilerParams(
            dimension_semantics=("parallel",)),
    )(x_t, *flat)

    return out_t.T[:N]                                           # [N, out_c]


# ----------------------------------------------------------------------------
# Deterministic parameter construction (PyTorch nn.Linear-style uniform init)
# ----------------------------------------------------------------------------
def init_linear(key, fan_in, fan_out):
    k1, k2 = jax.random.split(key)
    bound = 1.0 / (fan_in ** 0.5)
    w = jax.random.uniform(k1, (fan_in, fan_out), jnp.float32, -bound, bound)
    b = jax.random.uniform(k2, (fan_out,), jnp.float32, -bound, bound)
    return w, b


def build_params(key, in_channels, out_channels, D, W, skips):
    params = []
    keys = jax.random.split(key, D + 2)
    for i in range(D):
        if i == 0:
            fan_in = in_channels
        elif i in skips:
            fan_in = W + in_channels
        else:
            fan_in = W
        params.append(init_linear(keys[i], fan_in, W))
    params.append(init_linear(keys[D], W, W))                  # encoding_final
    params.append(init_linear(keys[D + 1], W, out_channels))   # out_layer
    return params


# ----------------------------------------------------------------------------
# Pure-JAX reference (f32, for correctness check)
# ----------------------------------------------------------------------------
def ref_forward(x, params, D, skips, neg_slope=0.01):
    input_x = x
    h = x
    for i in range(D):
        w, b = params[i]
        if i in skips:
            h = jnp.concatenate([input_x, h], axis=-1)
        h = h @ w + b
        h = jnp.where(h > 0, h, neg_slope * h)
    wf, bf = params[D]
    h = h @ wf + bf
    wo, bo = params[D + 1]
    return jax.nn.sigmoid(h @ wo + bo)


# ----------------------------------------------------------------------------
if __name__ == "__main__":
    # BaseNet(cfg): depth=4, hidden=32, skips=[2]; 8 input / 4 output channels.
    D = 4
    W = 32
    in_channels = 8
    out_channels = 4
    skips = (2,)
    N = 2000         # not a multiple of tm -> exercises the padded-tail path
    tm = 1024        # 2 grid steps -> both v7x TensorCores get work

    key = jax.random.PRNGKey(0)
    k_x, k_p = jax.random.split(key)
    x = jax.random.normal(k_x, (N, in_channels), jnp.float32)
    params = build_params(k_p, in_channels, out_channels, D, W, skips)

    out = basenet_forward(x, params, D=D, skips=skips, tm=tm)
    out = jax.block_until_ready(out)

    ref = ref_forward(x, params, D, skips)
    assert out.shape == (N, out_channels)
    # bf16 MXU operands vs f32 reference -> loosened tolerance (f32 accumulate).
    assert jnp.allclose(out, ref, atol=5e-2, rtol=5e-2), "mismatch vs reference"

    print("KERNEL_OK")
</pallas_src>

<mosaic_0001>
module attributes {stable_mosaic.version = 11 : i64} {
  func.func @kernel(%arg0: i32, %arg1: memref<8x1024xf32, #tpu.memory_space<vmem>>, %arg2: memref<32x8xbf16, #tpu.memory_space<vmem>>, %arg3: memref<32x1xf32, #tpu.memory_space<vmem>>, %arg4: memref<32x32xbf16, #tpu.memory_space<vmem>>, %arg5: memref<32x1xf32, #tpu.memory_space<vmem>>, %arg6: memref<32x8xbf16, #tpu.memory_space<vmem>>, %arg7: memref<32x32xbf16, #tpu.memory_space<vmem>>, %arg8: memref<32x1xf32, #tpu.memory_space<vmem>>, %arg9: memref<32x32xbf16, #tpu.memory_space<vmem>>, %arg10: memref<32x1xf32, #tpu.memory_space<vmem>>, %arg11: memref<32x32xbf16, #tpu.memory_space<vmem>>, %arg12: memref<32x1xf32, #tpu.memory_space<vmem>>, %arg13: memref<4x32xbf16, #tpu.memory_space<vmem>>, %arg14: memref<4x1xf32, #tpu.memory_space<vmem>>, %arg15: memref<4x1024xf32, #tpu.memory_space<vmem>>) attributes {dimension_semantics = [#tpu.dimension_semantics<parallel>], iteration_bounds = array<i64: 2>, scalar_prefetch = 0 : i64, scratch_operands = 0 : i64, tpu.core_type = #tpu.core_type<tc>, window_params = [{transform_indices = @transform_0, window_bounds = array<i64: 8, 1024>}, {pipeline_mode = #tpu.pipeline_mode<synchronous>, transform_indices = @transform_1, window_bounds = array<i64: 32, 8>}, {pipeline_mode = #tpu.pipeline_mode<synchronous>, transform_indices = @transform_2, window_bounds = array<i64: 32, 1>}, {pipeline_mode = #tpu.pipeline_mode<synchronous>, transform_indices = @transform_3, window_bounds = array<i64: 32, 32>}, {pipeline_mode = #tpu.pipeline_mode<synchronous>, transform_indices = @transform_4, window_bounds = array<i64: 32, 1>}, {pipeline_mode = #tpu.pipeline_mode<synchronous>, transform_indices = @transform_5, window_bounds = array<i64: 32, 8>}, {pipeline_mode = #tpu.pipeline_mode<synchronous>, transform_indices = @transform_6, window_bounds = array<i64: 32, 32>}, {pipeline_mode = #tpu.pipeline_mode<synchronous>, transform_indices = @transform_7, window_bounds = array<i64: 32, 1>}, {pipeline_mode = #tpu.pipeline_mode<synchronous>, transform_indices = @transform_8, window_bounds = array<i64: 32, 32>}, {pipeline_mode = #tpu.pipeline_mode<synchronous>, transform_indices = @transform_9, window_bounds = array<i64: 32, 1>}, {pipeline_mode = #tpu.pipeline_mode<synchronous>, transform_indices = @transform_10, window_bounds = array<i64: 32, 32>}, {pipeline_mode = #tpu.pipeline_mode<synchronous>, transform_indices = @transform_11, window_bounds = array<i64: 32, 1>}, {pipeline_mode = #tpu.pipeline_mode<synchronous>, transform_indices = @transform_12, window_bounds = array<i64: 4, 32>}, {pipeline_mode = #tpu.pipeline_mode<synchronous>, transform_indices = @transform_13, window_bounds = array<i64: 4, 1>}, {transform_indices = @transform_14, window_bounds = array<i64: 4, 1024>}]} {
    %c0 = arith.constant 0 : index
    %c0_0 = arith.constant 0 : index
    %0 = vector.load %arg1[%c0, %c0_0] : memref<8x1024xf32, #tpu.memory_space<vmem>>, vector<8x1024xf32>
    %1 = arith.truncf %0 : vector<8x1024xf32> to vector<8x1024xbf16>
    %c0_1 = arith.constant 0 : index
    %c0_2 = arith.constant 0 : index
    %2 = vector.load %arg2[%c0_1, %c0_2] : memref<32x8xbf16, #tpu.memory_space<vmem>>, vector<32x8xbf16>
    %c0_3 = arith.constant 0 : index
    %c0_4 = arith.constant 0 : index
    %3 = vector.load %arg3[%c0_3, %c0_4] : memref<32x1xf32, #tpu.memory_space<vmem>>, vector<32x1xf32>
    %4 = arith.truncf %0 : vector<8x1024xf32> to vector<8x1024xbf16>
    %cst = arith.constant dense<0.000000e+00> : vector<32x1024xf32>
    %5 = tpu.matmul %2, %4, %cst {dimension_numbers = #tpu.dot_dimension_numbers<[1], [0], [0], [1], [0, 0, 1, 1], [], []>} : vector<32x8xbf16>, vector<8x1024xbf16>, vector<32x1024xf32> -> vector<32x1024xf32>
    %6 = vector.broadcast %3 : vector<32x1xf32> to vector<32x1024xf32>
    %7 = arith.addf %5, %6 : vector<32x1024xf32>
    %cst_5 = arith.constant 0.000000e+00 : f32
    %8 = vector.broadcast %cst_5 : f32 to vector<32x1024xf32>
    %9 = arith.cmpf ogt, %7, %8 : vector<32x1024xf32>
    %cst_6 = arith.constant 0.00999999977 : f32
    %10 = vector.broadcast %cst_6 : f32 to vector<32x1024xf32>
    %11 = arith.mulf %10, %7 : vector<32x1024xf32>
    %12 = arith.select %9, %7, %11 : vector<32x1024xi1>, vector<32x1024xf32>
    %c0_7 = arith.constant 0 : index
    %c0_8 = arith.constant 0 : index
    %13 = vector.load %arg4[%c0_7, %c0_8] : memref<32x32xbf16, #tpu.memory_space<vmem>>, vector<32x32xbf16>
    %c0_9 = arith.constant 0 : index
    %c0_10 = arith.constant 0 : index
    %14 = vector.load %arg5[%c0_9, %c0_10] : memref<32x1xf32, #tpu.memory_space<vmem>>, vector<32x1xf32>
    %15 = arith.truncf %12 : vector<32x1024xf32> to vector<32x1024xbf16>
    %cst_11 = arith.constant dense<0.000000e+00> : vector<32x1024xf32>
    %16 = tpu.matmul %13, %15, %cst_11 {dimension_numbers = #tpu.dot_dimension_numbers<[1], [0], [0], [1], [0, 0, 1, 1], [], []>} : vector<32x32xbf16>, vector<32x1024xbf16>, vector<32x1024xf32> -> vector<32x1024xf32>
    %17 = vector.broadcast %14 : vector<32x1xf32> to vector<32x1024xf32>
    %18 = arith.addf %16, %17 : vector<32x1024xf32>
    %cst_12 = arith.constant 0.000000e+00 : f32
    %19 = vector.broadcast %cst_12 : f32 to vector<32x1024xf32>
    %20 = arith.cmpf ogt, %18, %19 : vector<32x1024xf32>
    %cst_13 = arith.constant 0.00999999977 : f32
    %21 = vector.broadcast %cst_13 : f32 to vector<32x1024xf32>
    %22 = arith.mulf %21, %18 : vector<32x1024xf32>
    %23 = arith.select %20, %18, %22 : vector<32x1024xi1>, vector<32x1024xf32>
    %c0_14 = arith.constant 0 : index
    %c0_15 = arith.constant 0 : index
    %24 = vector.load %arg6[%c0_14, %c0_15] : memref<32x8xbf16, #tpu.memory_space<vmem>>, vector<32x8xbf16>
    %c0_16 = arith.constant 0 : index
    %c0_17 = arith.constant 0 : index
    %25 = vector.load %arg7[%c0_16, %c0_17] : memref<32x32xbf16, #tpu.memory_space<vmem>>, vector<32x32xbf16>
    %c0_18 = arith.constant 0 : index
    %c0_19 = arith.constant 0 : index
    %26 = vector.load %arg8[%c0_18, %c0_19] : memref<32x1xf32, #tpu.memory_space<vmem>>, vector<32x1xf32>
    %cst_20 = arith.constant dense<0.000000e+00> : vector<32x1024xf32>
    %27 = tpu.matmul %24, %1, %cst_20 {dimension_numbers = #tpu.dot_dimension_numbers<[1], [0], [0], [1], [0, 0, 1, 1], [], []>} : vector<32x8xbf16>, vector<8x1024xbf16>, vector<32x1024xf32> -> vector<32x1024xf32>
    %28 = arith.truncf %23 : vector<32x1024xf32> to vector<32x1024xbf16>
    %cst_21 = arith.constant dense<0.000000e+00> : vector<32x1024xf32>
    %29 = tpu.matmul %25, %28, %cst_21 {dimension_numbers = #tpu.dot_dimension_numbers<[1], [0], [0], [1], [0, 0, 1, 1], [], []>} : vector<32x32xbf16>, vector<32x1024xbf16>, vector<32x1024xf32> -> vector<32x1024xf32>
    %30 = arith.addf %27, %29 : vector<32x1024xf32>
    %31 = vector.broadcast %26 : vector<32x1xf32> to vector<32x1024xf32>
    %32 = arith.addf %30, %31 : vector<32x1024xf32>
    %cst_22 = arith.constant 0.000000e+00 : f32
    %33 = vector.broadcast %cst_22 : f32 to vector<32x1024xf32>
    %34 = arith.cmpf ogt, %32, %33 : vector<32x1024xf32>
    %cst_23 = arith.constant 0.00999999977 : f32
    %35 = vector.broadcast %cst_23 : f32 to vector<32x1024xf32>
    %36 = arith.mulf %35, %32 : vector<32x1024xf32>
    %37 = arith.select %34, %32, %36 : vector<32x1024xi1>, vector<32x1024xf32>
    %c0_24 = arith.constant 0 : index
    %c0_25 = arith.constant 0 : index
    %38 = vector.load %arg9[%c0_24, %c0_25] : memref<32x32xbf16, #tpu.memory_space<vmem>>, vector<32x32xbf16>
    %c0_26 = arith.constant 0 : index
    %c0_27 = arith.constant 0 : index
    %39 = vector.load %arg10[%c0_26, %c0_27] : memref<32x1xf32, #tpu.memory_space<vmem>>, vector<32x1xf32>
    %40 = arith.truncf %37 : vector<32x1024xf32> to vector<32x1024xbf16>
    %cst_28 = arith.constant dense<0.000000e+00> : vector<32x1024xf32>
    %41 = tpu.matmul %38, %40, %cst_28 {dimension_numbers = #tpu.dot_dimension_numbers<[1], [0], [0], [1], [0, 0, 1, 1], [], []>} : vector<32x32xbf16>, vector<32x1024xbf16>, vector<32x1024xf32> -> vector<32x1024xf32>
    %42 = vector.broadcast %39 : vector<32x1xf32> to vector<32x1024xf32>
    %43 = arith.addf %41, %42 : vector<32x1024xf32>
    %cst_29 = arith.constant 0.000000e+00 : f32
    %44 = vector.broadcast %cst_29 : f32 to vector<32x1024xf32>
    %45 = arith.cmpf ogt, %43, %44 : vector<32x1024xf32>
    %cst_30 = arith.constant 0.00999999977 : f32
    %46 = vector.broadcast %cst_30 : f32 to vector<32x1024xf32>
    %47 = arith.mulf %46, %43 : vector<32x1024xf32>
    %48 = arith.select %45, %43, %47 : vector<32x1024xi1>, vector<32x1024xf32>
    %c0_31 = arith.constant 0 : index
    %c0_32 = arith.constant 0 : index
    %49 = vector.load %arg11[%c0_31, %c0_32] : memref<32x32xbf16, #tpu.memory_space<vmem>>, vector<32x32xbf16>
    %c0_33 = arith.constant 0 : index
    %c0_34 = arith.constant 0 : index
    %50 = vector.load %arg12[%c0_33, %c0_34] : memref<32x1xf32, #tpu.memory_space<vmem>>, vector<32x1xf32>
    %51 = arith.truncf %48 : vector<32x1024xf32> to vector<32x1024xbf16>
    %cst_35 = arith.constant dense<0.000000e+00> : vector<32x1024xf32>
    %52 = tpu.matmul %49, %51, %cst_35 {dimension_numbers = #tpu.dot_dimension_numbers<[1], [0], [0], [1], [0, 0, 1, 1], [], []>} : vector<32x32xbf16>, vector<32x1024xbf16>, vector<32x1024xf32> -> vector<32x1024xf32>
    %53 = vector.broadcast %50 : vector<32x1xf32> to vector<32x1024xf32>
    %54 = arith.addf %52, %53 : vector<32x1024xf32>
    %c0_36 = arith.constant 0 : index
    %c0_37 = arith.constant 0 : index
    %55 = vector.load %arg13[%c0_36, %c0_37] : memref<4x32xbf16, #tpu.memory_space<vmem>>, vector<4x32xbf16>
    %c0_38 = arith.constant 0 : index
    %c0_39 = arith.constant 0 : index
    %56 = vector.load %arg14[%c0_38, %c0_39] : memref<4x1xf32, #tpu.memory_space<vmem>>, vector<4x1xf32>
    %57 = arith.truncf %54 : vector<32x1024xf32> to vector<32x1024xbf16>
    %cst_40 = arith.constant dense<0.000000e+00> : vector<4x1024xf32>
    %58 = tpu.matmul %55, %57, %cst_40 {dimension_numbers = #tpu.dot_dimension_numbers<[1], [0], [0], [1], [0, 0, 1, 1], [], []>} : vector<4x32xbf16>, vector<32x1024xbf16>, vector<4x1024xf32> -> vector<4x1024xf32>
    %59 = vector.broadcast %56 : vector<4x1xf32> to vector<4x1024xf32>
    %60 = arith.addf %58, %59 : vector<4x1024xf32>
    %61 = arith.negf %60 : vector<4x1024xf32>
    %62 = math.exp %61 : vector<4x1024xf32>
    %cst_41 = arith.constant 1.000000e+00 : f32
    %63 = vector.broadcast %cst_41 : f32 to vector<4x1024xf32>
    %64 = arith.addf %63, %62 : vector<4x1024xf32>
    %65 = arith.divf %63, %64 : vector<4x1024xf32>
    %c0_42 = arith.constant 0 : index
    %c0_43 = arith.constant 0 : index
    %66 = vector.load %arg15[%c0_42, %c0_43] : memref<4x1024xf32, #tpu.memory_space<vmem>>, vector<4x1024xf32>
    tpu.vector_store %arg15[%c0_42, %c0_43], %65 {strides = array<i32>} : memref<4x1024xf32, #tpu.memory_space<vmem>>, vector<4x1024xf32>,
    return
  }
  func.func @transform_0(%arg0: i32) -> (i32, i32) {
    %c0_i32 = arith.constant 0 : i32
    %c0_i32_0 = arith.constant 0 : i32
    return %c0_i32, %arg0 : i32, i32
  }
  func.func @transform_1(%arg0: i32) -> (i32, i32) {
    %c0_i32 = arith.constant 0 : i32
    %c0_i32_0 = arith.constant 0 : i32
    %c0_i32_1 = arith.constant 0 : i32
    return %c0_i32, %c0_i32_0 : i32, i32
  }
  func.func @transform_2(%arg0: i32) -> (i32, i32) {
    %c0_i32 = arith.constant 0 : i32
    %c0_i32_0 = arith.constant 0 : i32
    %c0_i32_1 = arith.constant 0 : i32
    return %c0_i32, %c0_i32_0 : i32, i32
  }
  func.func @transform_3(%arg0: i32) -> (i32, i32) {
    %c0_i32 = arith.constant 0 : i32
    %c0_i32_0 = arith.constant 0 : i32
    %c0_i32_1 = arith.constant 0 : i32
    return %c0_i32, %c0_i32_0 : i32, i32
  }
  func.func @transform_4(%arg0: i32) -> (i32, i32) {
    %c0_i32 = arith.constant 0 : i32
    %c0_i32_0 = arith.constant 0 : i32
    %c0_i32_1 = arith.constant 0 : i32
    return %c0_i32, %c0_i32_0 : i32, i32
  }
  func.func @transform_5(%arg0: i32) -> (i32, i32) {
    %c0_i32 = arith.constant 0 : i32
    %c0_i32_0 = arith.constant 0 : i32
    %c0_i32_1 = arith.constant 0 : i32
    return %c0_i32, %c0_i32_0 : i32, i32
  }
  func.func @transform_6(%arg0: i32) -> (i32, i32) {
    %c0_i32 = arith.constant 0 : i32
    %c0_i32_0 = arith.constant 0 : i32
    %c0_i32_1 = arith.constant 0 : i32
    return %c0_i32, %c0_i32_0 : i32, i32
  }
  func.func @transform_7(%arg0: i32) -> (i32, i32) {
    %c0_i32 = arith.constant 0 : i32
    %c0_i32_0 = arith.constant 0 : i32
    %c0_i32_1 = arith.constant 0 : i32
    return %c0_i32, %c0_i32_0 : i32, i32
  }
  func.func @transform_8(%arg0: i32) -> (i32, i32) {
    %c0_i32 = arith.constant 0 : i32
    %c0_i32_0 = arith.constant 0 : i32
    %c0_i32_1 = arith.constant 0 : i32
    return %c0_i32, %c0_i32_0 : i32, i32
  }
  func.func @transform_9(%arg0: i32) -> (i32, i32) {
    %c0_i32 = arith.constant 0 : i32
    %c0_i32_0 = arith.constant 0 : i32
    %c0_i32_1 = arith.constant 0 : i32
    return %c0_i32, %c0_i32_0 : i32, i32
  }
  func.func @transform_10(%arg0: i32) -> (i32, i32) {
    %c0_i32 = arith.constant 0 : i32
    %c0_i32_0 = arith.constant 0 : i32
    %c0_i32_1 = arith.constant 0 : i32
    return %c0_i32, %c0_i32_0 : i32, i32
  }
  func.func @transform_11(%arg0: i32) -> (i32, i32) {
    %c0_i32 = arith.constant 0 : i32
    %c0_i32_0 = arith.constant 0 : i32
    %c0_i32_1 = arith.constant 0 : i32
    return %c0_i32, %c0_i32_0 : i32, i32
  }
  func.func @transform_12(%arg0: i32) -> (i32, i32) {
    %c0_i32 = arith.constant 0 : i32
    %c0_i32_0 = arith.constant 0 : i32
    %c0_i32_1 = arith.constant 0 : i32
    return %c0_i32, %c0_i32_0 : i32, i32
  }
  func.func @transform_13(%arg0: i32) -> (i32, i32) {
    %c0_i32 = arith.constant 0 : i32
    %c0_i32_0 = arith.constant 0 : i32
    %c0_i32_1 = arith.constant 0 : i32
    return %c0_i32, %c0_i32_0 : i32, i32
  }
  func.func @transform_14(%arg0: i32) -> (i32, i32) {
    %c0_i32 = arith.constant 0 : i32
    %c0_i32_0 = arith.constant 0 : i32
    return %c0_i32, %arg0 : i32, i32
  }
}

</mosaic_0001>

<bundles_post_ra>
// kernel: tpu_custom_call.1
= control target key start
LH: loop header
LB: loop body
LE: loop exit
PB: predicated region body
PF: predicated region fallthrough
CT: control target
= control target key end

     0   :  { %19 = vsyncpa [#allocation3], 0  ;;  %s4066_s0 = inlined_call_operand.vmem [shape: f32[8,2048], index: 0, kind: input, shape index: {}]   ;;  %s4067_s1 = inlined_call_operand.vmem [shape: bf16[32,8], index: 1, kind: input, shape index: {}]   ;;  %s4068_s2 = inlined_call_operand.vmem [shape: f32[32,1], index: 2, kind: input, shape index: {}]   ;;  %s4069_s3 = inlined_call_operand.vmem [shape: bf16[32,32], index: 3, kind: input, shape index: {}]   ;;  %s4070_s4 = inlined_call_operand.vmem [shape: f32[32,1], index: 4, kind: input, shape index: {}]   ;;  %s4071_s5 = inlined_call_operand.vmem [shape: bf16[32,8], index: 5, kind: input, shape index: {}]   ;;  %s4072_s6 = inlined_call_operand.vmem [shape: bf16[32,32], index: 6, kind: input, shape index: {}]   ;;  %s4073_s7 = inlined_call_operand.vmem [shape: f32[32,1], index: 7, kind: input, shape index: {}]   ;;  %s4074_s8 = inlined_call_operand.vmem [shape: bf16[32,32], index: 8, kind: input, shape index: {}]   ;;  %s4075_s9 = inlined_call_operand.vmem [shape: f32[32,1], index: 9, kind: input, shape index: {}]   ;;  %s4076_s10 = inlined_call_operand.vmem [shape: bf16[32,32], index: 10, kind: input, shape index: {}]   ;;  %s4077_s11 = inlined_call_operand.vmem [shape: f32[32,1], index: 11, kind: input, shape index: {}]   ;;  %s4078_s12 = inlined_call_operand.vmem [shape: bf16[4,32], index: 12, kind: input, shape index: {}]   ;;  %s4079_s13 = inlined_call_operand.vmem [shape: f32[4,1], index: 13, kind: input, shape index: {}]   ;;  %s4080_s14 = inlined_call_operand.hbm [shape: f32[4,2048], index: 14, kind: output, shape index: {}]  }
   0x1   :  { %21 = vsyncpa [#allocation3 + $0x1], 0  ;;  %s3189_s29 = smov 0   ;;  %s3191_s30 = smov 0  }
   0x2   :  { %s3193_s15 = smov 0   ;;  %s3195_s16 = smov 0  }
   0x3 LB: > { %4087 = sst [smem:[#allocation5_spill]] %s3098_s29  ;;  %s3210_s17 = sadd.s32 4294967295, %s3110_s16   ;;  %s3110_s16 = sphi %s3195_s16, %s4098_s16   ;;  %s3106_s15 = sphi %s3193_s15, %s4100_s15   ;;  %s3102_s30 = sphi %s3191_s30, %s4102_s30   ;;  %s3098_s29 = sphi %s3189_s29, %s4101_s29  }
   0x4   : > { %4088 = sst [smem:[#allocation6_spill]] %s3106_s15  ;;  %s2837_s18 = sadd.s32 4294967294, %s3110_s16  }
   0x5   : > { %4089 = sst [smem:[#allocation7_spill]] %s3110_s16  ;;  %s3214_s19 = sadd.s32 1, %s3110_s16  }
   0x6   : > { %4090 = sst [smem:[#allocation8_spill]] %s3214_s19  ;;  %s333_s20 = sadd.s32 1, %s3106_s15 }
   0x7   : > { %s330_s21 = ssub.s32 %s3110_s16, %s3214_s19  ;;  %p343_p0 = scmp.ne.s32.totalorder %s3106_s15, %s3102_s30 }
   0x8   : > { %p331_p1 = scmp.eq.s32.totalorder %s330_s21, 0  ;;  %p344_p2 = scmp.eq.s32.totalorder %s3210_s17, 1 }
   0x9   : > { %p349_p3 = scmp.ne.s32.totalorder %s3102_s30, %s3098_s29  ;;  %p350_p4 = scmp.eq.s32.totalorder %s2837_s18, 1 }
   0xa   : > { %s3225_s22 = scalar_select %p331_p1, %s3106_s15, %s333_s20  }
   0xb   : > { %p3227_p5 = por %p344_p2, %p343_p0  ;;  %p3231_p6 = por %p350_p4, %p349_p3 }
   0xc   : > { %4091 = sst [smem:[#allocation9_spill]] %s3225_s22  ;;  %p2840_p7 = scmp.ge.s32.totalorder %s3110_s16, 1 }
   0xd   : > { %s4093_s24 = scalar_select %p3231_p6, 1, 0 }
   0xe   : > { %p416_p8 = scmp.lt.s32.totalorder %s3110_s16, 3 }
   0xf   : > { %4094 = sst [smem:[#allocation10_spill]] %s4093_s24 }
  0x10   : > { %p417_p9 = pnand %p2840_p7, %p416_p8 }
  0x11   : > { %s2842_s25 = sshll.u32 (!%p417_p9), %s3210_s17, 3  ;;  %v3112_v0 = vmov (!%p417_p9), 0   ;;  %v490_v1 = vld [vmem:[%s4068_s2] sm:$0xff] (!%p417_p9)  ;;  %v492_v2 = vld [vmem:[%s4068_s2 + $0x10] sm:$0xff] (!%p417_p9)  ;;  %v491_v3 = vld [vmem:[%s4068_s2 + $0x8] sm:$0xff] (!%p417_p9)  ;;  %vm531_vm0 = vcmask (!%p417_p9), 1043456  }
  0x12   : > { %420 = sbr.rel (%p417_p9) target bundleno = 1540 (0x604), region = 76  ;;  %p463_p10 = scmp.lt.s32.totalorder (!%p417_p9), %s2842_s25, 15  ;;  %588 = vmatprep.mubr.bf16.mxu0 (!%p417_p9), %v3112_v0  ;;  %641 = vmatprep.mubr.bf16.mxu1 (!%p417_p9), %v3112_v0  ;;  %v493_v4 = vld [vmem:[%s4068_s2 + $0x18] sm:$0xff] (!%p417_p9)  ;;  %v868_v5 = vld [vmem:[%s4070_s4] sm:$0xff] (!%p417_p9)  ;;  %v869_v24 = vld [vmem:[%s4070_s4 + $0x8] sm:$0xff] (!%p417_p9)  ;;  %vm524_vm1 = vcmask (!%p417_p9), 64512  }
  0x13   : > { %3002 = vset.pattern.permute.xlu0 (!%p417_p9), %v3112_v0  ;;  %3003 = vset.pattern.permute.xlu1 (!%p417_p9), %v3112_v0  ;;  %v3004_v21 = vld [vmem:[%s4067_s1] sm:$0xff] (!%p417_p9)   ;;  %v870_v28 = vld [vmem:[%s4070_s4 + $0x10] sm:$0xff] (!%p417_p9)  ;;  %v871_v29 = vld [vmem:[%s4070_s4 + $0x18] sm:$0xff] (!%p417_p9)  ;;  %s2929_s20 = sshll.u32 (!%p417_p9), %s3210_s17, 9  ;;  %s3113_s16 = smov (!%p417_p9), [#allocation2]  }
  0x14   : > { %496 = vperm.xlu0 (!%p417_p9), %3002, %v490_v1   ;;  %506 = vperm.xlu1 (!%p417_p9), %3003, %v492_v2   ;;  %v3005_v30 = vld [vmem:[%s4067_s1 + $0x8] sm:$0xff] (!%p417_p9)   ;;  %v1241_v31 = vld [vmem:[%s4073_s7] sm:$0xff] (!%p417_p9)  ;;  %v1243_v33 = vld [vmem:[%s4073_s7 + $0x10] sm:$0xff] (!%p417_p9)  ;;  %s4022_s29 = scalar_lea.hbm (!%p417_p9), %s4080_s14, %s2929_s20  ;;  %s3052_s19 = sshll.u32 (!%p417_p9), %s3113_s16, 4  ;;  %s3053_s19 = int_to_ptr.vmem [resolvable:$false] %s3052_s19 }
  0x15   : > { %v1242_v32 = vld [vmem:[%s4073_s7 + $0x8] sm:$0xff] (!%p417_p9)  ;;  %v1244_v34 = vld [vmem:[%s4073_s7 + $0x18] sm:$0xff] (!%p417_p9)  ;;  %v1869_v35 = vld [vmem:[%s4075_s9] sm:$0xff] (!%p417_p9) }
  0x16   : > { %v1870_v36 = vld [vmem:[%s4075_s9 + $0x8] sm:$0xff] (!%p417_p9)  ;;  %v1871_v37 = vld [vmem:[%s4075_s9 + $0x10] sm:$0xff] (!%p417_p9)  ;;  %v1872_v38 = vld [vmem:[%s4075_s9 + $0x18] sm:$0xff] (!%p417_p9) }
  0x17   : > { %v2237_v39 = vld [vmem:[%s4077_s11] sm:$0xff] (!%p417_p9)  ;;  %v2238_v40 = vld [vmem:[%s4077_s11 + $0x8] sm:$0xff] (!%p417_p9)  ;;  %v2239_v41 = vld [vmem:[%s4077_s11 + $0x10] sm:$0xff] (!%p417_p9) }
  0x18   : > { %501 = vperm.xlu0 (!%p417_p9), %3002, %v491_v3   ;;  %511 = vperm.xlu1 (!%p417_p9), %3003, %v493_v4   ;;  %v2240_v42 = vld [vmem:[%s4077_s11 + $0x18] sm:$0xff] (!%p417_p9)  ;;  %v2506_v43 = vld [vmem:[%s4079_s13] sm:$0xf] (!%p417_p9) }
  0x19   : > { %s4104_s25 = smov (!%p463_p10, %s2842_s25), 15 }
  0x1a   : > { %s2843_s22 = sshll.u32 %s4104_s25, 3  ;;  %s459_s25 = sand.u32 1, %s3102_s30  }
  0x1b   : > { %s466_s24 = scalar_lea.vmem %s4066_s0, %s2843_s22  ;;  %s2841_s28 = sshll.u32 %s459_s25, 5 }
  0x1c   : > { %v471_v6 = vld [vmem:[%s466_s24 + $0x8] sm:$0xff]  ;;  %v473_v7 = vld [vmem:[%s466_s24 + $0x18] sm:$0xff]  ;;  %v470_v8 = vld [vmem:[%s466_s24] sm:$0xff]  ;;  %890 = vperm.xlu0 %3002, %v868_v5   ;;  %895 = vperm.xlu1 %3003, %v869_v24   ;;  %s461_s18 = scalar_lea.vmem [#allocation2], %s2841_s28  ;;  %s2764_s15 = scalar_lea.sflag [#allocation3], %s459_s25 }
  0x1d   : > { %v3260_v9 = vpack.c.bf16 %v471_v6, %v471_v6  ;;  %v3262_v10 = vpack.c.bf16 %v473_v7, %v473_v7  ;;  %v478_v11 = vpack.c.bf16 %v470_v8, %v470_v8  ;;  %v472_v12 = vld [vmem:[%s466_s24 + $0x10] sm:$0xff]  ;;  %v475_v13 = vld [vmem:[%s466_s24 + $0x28] sm:$0xff]  ;;  %v477_v14 = vld [vmem:[%s466_s24 + $0x38] sm:$0xff]  ;;  %s2778_s21 = sshll.u32 %s461_s18, 4  ;;  %s3054_s22 = scalar_lea.vmem %s3053_s19, 1024  ;;  %s4024_s21 = int_to_ptr.vmem [resolvable:$true] %s2778_s21 }
  0x1e   : > { %v480_v15 = vpack.c.bf16 %v472_v12, %v472_v12  ;;  %v3264_v16 = vpack.c.bf16 %v475_v13, %v475_v13  ;;  %v3266_v17 = vpack.c.bf16 %v477_v14, %v477_v14  ;;  %v474_v18 = vld [vmem:[%s466_s24 + $0x20] sm:$0xff]  ;;  %v476_v19 = vld [vmem:[%s466_s24 + $0x30] sm:$0xff]  ;;  %s3048_s17 = scalar_lea.vmem %s4024_s21, 512  ;;  %p3055_p0 = scmp.lt.s32.totalorder %s4024_s21, %s3053_s19 }
  0x1f   : > { %2846 = vmatprep.subr.msk.bf16.mxu0 %vm531_vm0, %v3260_v9  ;;  %2849 = vmatprep.subr.msk.bf16.mxu1 %vm531_vm0, %v3262_v10  ;;  %v3273_v20 = vsel %vm531_vm0, %v478_v11, 0  ;;  %v482_v22 = vpack.c.bf16 %v474_v18, %v474_v18  ;;  %v484_v23 = vpack.c.bf16 %v476_v19, %v476_v19  ;;  %p3049_p11 = scmp.ne.s32.totalorder %s4024_s21, %s3048_s17  ;;  %p3056_p1 = scmp.lt.s32.totalorder %s3054_s22, %s3048_s17 }
  0x20   : > { %557 = vmatpush1.bf16.msra.mxu0 %v3273_v20  ;;  %v3283_v25 = vsel %vm531_vm0, %v480_v15, 0  ;;  %900 = vperm.xlu0 %3002, %v870_v28  }
  0x21   : > { %610 = vmatpush1.bf16.msra.mxu1 %v3283_v25  ;;  %2852 = vmatprep.subr.msk.bf16.mxu0 %vm531_vm0, %v3264_v16  ;;  %v3289_v26 = vsel %vm531_vm0, %v482_v22, 0  ;;  %v3292_v27 = vsel %vm531_vm0, %v484_v23, 0  ;;  %p3050_p12 = pnand %p3049_p11, %p3227_p5  ;;  %p3057_p2 = por %p3056_p1, %p3055_p0 }
  0x22   : > { %2855 = vmatprep.subr.msk.bf16.mxu1 %vm531_vm0, %v3266_v17  ;;  %905 = vperm.xlu1 %3003, %v871_v29  }
  0x23   : > { %2847 = vmatmul.mubr.msk.bf16.vlgmr.msra.gmra.mrb[0].mxu0 %vm524_vm1, %v3004_v21  ;;  %p3051_p13 = pneg %p3050_p12 }
  0x24   : > { %2850 = vmatmul.mubr.msk.bf16.vlgmr.msra.gmra.mrb[0].mxu1 %vm524_vm1, %v3004_v21  ;;  %663 = vmatpush1.bf16.msra.mxu0 %v3289_v26 }
  0x25   : > { %716 = vmatpush1.bf16.msra.mxu1 %v3292_v27  ;;  %598 = vmatprep.mubr.bf16.mxu0 %v3112_v0  ;;  %p3058_p3 = pnand %p3057_p2, %p3051_p13 }
  0x26   : > { %651 = vmatprep.mubr.bf16.mxu1 %v3112_v0  ;;  %1719 = vperm.xlu0 %3002, %v1241_v31  }
  0x27   : > { %1724 = vperm.xlu1 %3003, %v1242_v32  }
  0x2a   : > { %1729 = vperm.xlu0 %3002, %v1243_v33  }
  0x2b   : > { %2848 = vmatmul.mubr.msk.bf16.gmra.mrb[4].mxu0 %vm524_vm1, %v3005_v30  ;;  %1734 = vperm.xlu1 %3003, %v1244_v34  }
  0x2c   : > { %2851 = vmatmul.mubr.msk.bf16.gmra.mrb[4].mxu1 %vm524_vm1, %v3005_v30  ;;  %694 = vmatprep.mubr.bf16.mxu0 %v3112_v0 }
  0x2d   : > { %747 = vmatprep.mubr.bf16.mxu1 %v3112_v0 }
  0x2e   : > { %1891 = vperm.xlu0 %3002, %v1869_v35  }
  0x2f   : > { %1896 = vperm.xlu1 %3003, %v1870_v36  }
  0x32   : > { %1901 = vperm.xlu0 %3002, %v1871_v37  }
  0x33   : > { %2853 = vmatmul.mubr.msk.bf16.vlgmr.msra.gmra.mrb[8].mxu0 %vm524_vm1, %v3004_v21  ;;  %1906 = vperm.xlu1 %3003, %v1872_v38  }
  0x34   : > { %2856 = vmatmul.mubr.msk.bf16.vlgmr.msra.gmra.mrb[8].mxu1 %vm524_vm1, %v3004_v21  ;;  %704 = vmatprep.mubr.bf16.mxu0 %v3112_v0 }
  0x35   : > { %757 = vmatprep.mubr.bf16.mxu1 %v3112_v0 }
  0x36   : > { %2259 = vperm.xlu0 %3002, %v2237_v39  }
  0x37   : > { %2264 = vperm.xlu1 %3003, %v2238_v40  }
  0x3a   : > { %2269 = vperm.xlu0 %3002, %v2239_v41  }
  0x3b   : > { %2854 = vmatmul.mubr.msk.bf16.gmra.mrb[12].mxu0 %vm524_vm1, %v3005_v30  ;;  %2274 = vperm.xlu1 %3003, %v2240_v42  }
  0x3c   : > { %2857 = vmatmul.mubr.msk.bf16.gmra.mrb[12].mxu1 %vm524_vm1, %v3005_v30  ;;  %957 = vmatprep.mubr.bf16.mxu0 %v3112_v0 }
  0x3d   : > { %1010 = vmatprep.mubr.bf16.mxu1 %v3112_v0 }
  0x3e   : > { %2525 = vperm.xlu0 %3002, %v2506_v43  }
  0x93   : > { %v3362_v44 = vpop.permute.xlu0 %496  ;;  %v3373_v3 = vpop.permute.xlu1 %506 }
  0x97   : > { %v3364_v45 = vpop.permute.xlu0 %501  ;;  %v3386_v36 = vpop.permute.xlu1 %511 }
  0xf6   : > { %v590_v46 = vpop.f32.mrb[0].mxu0 }
  0xf7   : > { %v591_v47 = vadd.f32 %v590_v46, %v3362_v44  ;;  %v643_v48 = vpop.f32.mrb[0].mxu1  ;;  %v592_v49 = vpop.f32.mrb[1].mxu0 }
  0xf8   : > { %v644_v50 = vadd.f32 %v643_v48, %v3362_v44  ;;  %v593_v51 = vadd.f32 %v592_v49, %v3362_v44  ;;  %v645_v52 = vpop.f32.mrb[1].mxu1  ;;  %v594_v53 = vpop.f32.mrb[2].mxu0 }
  0xf9   : > { %v800_v54 = vmul.f32 0.01, %v591_v47  ;;  %v646_v55 = vadd.f32 %v645_v52, %v3362_v44  ;;  %v595_v56 = vadd.f32 %v594_v53, %v3364_v45  ;;  %v647_v57 = vpop.f32.mrb[2].mxu1  ;;  %v596_v58 = vpop.f32.mrb[3].mxu0  ;;  %vm768_vm2 = vcmp.gt.f32.partialorder %v591_v47, 0.0 }
  0xfa   : > { %v802_v59 = vmul.f32 0.01, %v644_v50  ;;  %vm770_vm3 = vcmp.gt.f32.partialorder %v644_v50, 0.0  ;;  %vm769_vm4 = vcmp.gt.f32.partialorder %v593_v51, 0.0  ;;  %v801_v60 = vmul.f32 0.01, %v593_v51 }
  0xfb   : > { %vm776_vm5 = vcmp.gt.f32.partialorder %v595_v56, 0.0  ;;  %v649_v61 = vpop.f32.mrb[3].mxu1  ;;  %v803_v62 = vmul.f32 0.01, %v646_v55  ;;  %v808_v63 = vmul.f32 0.01, %v595_v56  ;;  %v648_v1 = vadd.f32 %v647_v57, %v3364_v45 }
  0xfc   : > { %v597_v2 = vadd.f32 %v596_v58, %v3364_v45  ;;  %v832_v4 = vsel %vm768_vm2, %v591_v47, %v800_v54  ;;  %vm771_vm6 = vcmp.gt.f32.partialorder %v646_v55, 0.0  ;;  %v650_v5 = vadd.f32 %v649_v61, %v3364_v45 }
  0xfd   : > { %v3376_v6 = vsel %vm770_vm3, %v644_v50, %v802_v59  ;;  %v840_v7 = vsel %vm776_vm5, %v595_v56, %v808_v63  ;;  %vm778_vm7 = vcmp.gt.f32.partialorder %v648_v1, 0.0  ;;  %v810_v8 = vmul.f32 0.01, %v648_v1 }
  0xfe   : > { %v600_v11 = vpop.f32.mrb[4].mxu0  ;;  %v872_v12 = vpack.c.bf16 %v840_v7, %v832_v4  ;;  %vm777_vm8 = vcmp.gt.f32.partialorder %v597_v2, 0.0  ;;  %v809_v13 = vmul.f32 0.01, %v597_v2  ;;  %v833_v15 = vsel %vm769_vm4, %v593_v51, %v801_v60 }
  0xff   : > { %v653_v14 = vpop.f32.mrb[4].mxu1  ;;  %v842_v18 = vsel %vm778_vm7, %v648_v1, %v810_v8  ;;  %v601_v19 = vadd.f32 %v600_v11, %v3373_v3  ;;  %v602_v22 = vpop.f32.mrb[5].mxu0  ;;  %v835_v24 = vsel %vm771_vm6, %v646_v55, %v803_v62  ;;  %v811_v29 = vmul.f32 0.01, %v650_v5 }
 0x100   : > { %v654_v21 = vadd.f32 %v653_v14, %v3373_v3  ;;  %v655_v23 = vpop.f32.mrb[5].mxu1  ;;  %v874_v28 = vpack.c.bf16 %v842_v18, %v3376_v6  ;;  %v603_v30 = vadd.f32 %v602_v22, %v3373_v3  ;;  %v604_v32 = vpop.f32.mrb[6].mxu0  ;;  %vm779_vm9 = vcmp.gt.f32.partialorder %v650_v5, 0.0 }
 0x101   : > { %v656_v31 = vadd.f32 %v655_v23, %v3373_v3  ;;  %v657_v33 = vpop.f32.mrb[6].mxu1  ;;  %vm784_vm10 = vcmp.gt.f32.partialorder %v601_v19, 0.0  ;;  %v816_v34 = vmul.f32 0.01, %v601_v19  ;;  %v841_v35 = vsel %vm777_vm8, %v597_v2, %v809_v13  ;;  %v606_v42 = vpop.f32.mrb[7].mxu0 }
 0x102   : > { %vm786_vm11 = vcmp.gt.f32.partialorder %v654_v21, 0.0  ;;  %v818_v37 = vmul.f32 0.01, %v654_v21  ;;  %vm785_vm12 = vcmp.gt.f32.partialorder %v603_v30, 0.0  ;;  %v817_v38 = vmul.f32 0.01, %v603_v30 }
 0x103   : > { %vm787_vm13 = vcmp.gt.f32.partialorder %v656_v31, 0.0  ;;  %v819_v39 = vmul.f32 0.01, %v656_v31  ;;  %v605_v40 = vadd.f32 %v604_v32, %v3386_v36  ;;  %v658_v41 = vadd.f32 %v657_v33, %v3386_v36  ;;  %v659_v43 = vpop.f32.mrb[7].mxu1 }
 0x104   : > { %v607_v46 = vadd.f32 %v606_v42, %v3386_v36  ;;  %v660_v47 = vadd.f32 %v659_v43, %v3386_v36  ;;  %v873_v48 = vpack.c.bf16 %v841_v35, %v833_v15  ;;  %v843_v49 = vsel %vm779_vm9, %v650_v5, %v811_v29 }
 0x105   : > { %vm792_vm14 = vcmp.gt.f32.partialorder %v605_v40, 0.0  ;;  %v824_v50 = vmul.f32 0.01, %v605_v40  ;;  %vm794_vm15 = vcmp.gt.f32.partialorder %v658_v41, 0.0  ;;  %v826_v51 = vmul.f32 0.01, %v658_v41 }
 0x106   : > { %v848_v52 = vsel %vm784_vm10, %v601_v19, %v816_v34  ;;  %v3395_v53 = vsel %vm786_vm11, %v654_v21, %v818_v37  ;;  %vm793_vm2 = vcmp.gt.f32.partialorder %v607_v46, 0.0  ;;  %v825_v54 = vmul.f32 0.01, %v607_v46  ;;  %925 = vmatprep.subr.bf16.mxu0 %v873_v48  ;;  %v696_v58 = vpop.f32.mrb[8].mxu0 }
 0x107   : > { %v856_v55 = vsel %vm792_vm14, %v605_v40, %v824_v50  ;;  %v3397_v56 = vsel %vm794_vm15, %v658_v41, %v826_v51  ;;  %vm795_vm3 = vcmp.gt.f32.partialorder %v660_v47, 0.0  ;;  %v875_v57 = vpack.c.bf16 %v843_v49, %v835_v24  ;;  %926 = vmatpush1.bf16.msra.mxu0 %v872_v12  ;;  %v749_v59 = vpop.f32.mrb[8].mxu1  ;;  %v698_v1 = vpop.f32.mrb[9].mxu0 }
 0x108   : > { %v880_v60 = vpack.c.bf16 %v856_v55, %v848_v52  ;;  %v882_v61 = vpack.c.bf16 %v3397_v56, %v3395_v53  ;;  %v697_v62 = vadd.f32 %v696_v58, %v3362_v44  ;;  %v750_v63 = vadd.f32 %v749_v59, %v3362_v44  ;;  %v751_v2 = vpop.f32.mrb[9].mxu1  ;;  %v700_v7 = vpop.f32.mrb[10].mxu0 }
 0x109   : > { %vm918_vm4 = vcmask 261120   ;;  %v827_v4 = vmul.f32 0.01, %v660_v47  ;;  %978 = vmatprep.subr.bf16.mxu1 %v875_v57  ;;  %v3404_v5 = vadd.f32 %v698_v1, %v3362_v44  ;;  %v3407_v6 = vadd.f32 %v751_v2, %v3362_v44  ;;  %v753_v8 = vpop.f32.mrb[10].mxu1  ;;  %v702_v23 = vpop.f32.mrb[11].mxu0 }
 0x10a   : > { %v849_v11 = vsel %vm785_vm12, %v603_v30, %v817_v38  ;;  %979 = vmatpush1.bf16.msra.mxu1 %v874_v28  ;;  %vm772_vm5 = vcmp.gt.f32.partialorder %v697_v62, 0.0  ;;  %v804_v12 = vmul.f32 0.01, %v697_v62  ;;  %v857_v13 = vsel %vm793_vm2, %v607_v46, %v825_v54  ;;  %v755_v24 = vpop.f32.mrb[11].mxu1 }
 0x10b   : > { %v851_v14 = vsel %vm787_vm13, %v656_v31, %v819_v39  ;;  %vm774_vm6 = vcmp.gt.f32.partialorder %v750_v63, 0.0  ;;  %v806_v15 = vmul.f32 0.01, %v750_v63  ;;  %vm773_vm7 = vcmp.gt.f32.partialorder %v3404_v5, 0.0 }
 0x10c   : > { %v3414_v18 = vmul.f32 0.01, %v3404_v5  ;;  %v3416_v44 = vsel %vm772_vm5, %v697_v62, %v804_v12  ;;  %v3419_v19 = vmul.f32 0.01, %v3407_v6  ;;  %v701_v21 = vadd.f32 %v700_v7, %v3364_v45 }
 0x10d   : > { %v754_v22 = vadd.f32 %v753_v8, %v3364_v45  ;;  %v703_v28 = vadd.f32 %v702_v23, %v3364_v45  ;;  %v3425_v29 = vadd.f32 %v755_v24, %v3364_v45  ;;  %v881_v30 = vpack.c.bf16 %v857_v13, %v849_v11  ;;  %v3436_v45 = vld [vmem:[%s4069_s3] sm:$0xff]   ;;  %v3007_v13 = vld [vmem:[%s4069_s3 + $0x8] sm:$0xff]  }
 0x10e   : > { %v859_v31 = vsel %vm795_vm3, %v660_v47, %v827_v4  ;;  %v706_v32 = vpop.f32.mrb[12].mxu0  ;;  %vm775_vm8 = vcmp.gt.f32.partialorder %v3407_v6, 0.0  ;;  %vm780_vm9 = vcmp.gt.f32.partialorder %v701_v21, 0.0  ;;  %v812_v33 = vmul.f32 0.01, %v701_v21 }
 0x10f   : > { %vm782_vm10 = vcmp.gt.f32.partialorder %v754_v22, 0.0  ;;  %v814_v34 = vmul.f32 0.01, %v754_v22  ;;  %v3430_v35 = vsel %vm774_vm6, %v750_v63, %v806_v15  ;;  %vm781_vm11 = vcmp.gt.f32.partialorder %v703_v28, 0.0  ;;  %927 = vmatprep.subr.bf16.mxu0 %v881_v30  ;;  %v759_v42 = vpop.f32.mrb[12].mxu1  ;;  %v708_v43 = vpop.f32.mrb[13].mxu0 }
 0x110   : > { %v813_v37 = vmul.f32 0.01, %v703_v28  ;;  %vm783_vm12 = vcmp.gt.f32.partialorder %v3425_v29, 0.0  ;;  %v3438_v38 = vsel %vm780_vm9, %v701_v21, %v812_v33  ;;  %v883_v40 = vpack.c.bf16 %v859_v31, %v851_v14  ;;  %928 = vmatpush1.bf16.msra.mxu0 %v880_v60  ;;  %v761_v50 = vpop.f32.mrb[13].mxu1  ;;  %v710_v51 = vpop.f32.mrb[14].mxu0 }
 0x111   : > { %v3440_v39 = vsel %vm782_vm10, %v754_v22, %v814_v34  ;;  %v707_v41 = vadd.f32 %v706_v32, %v3373_v3  ;;  %v876_v46 = vpack.c.bf16 %v3438_v38, %v3416_v44  ;;  %v760_v48 = vadd.f32 %v759_v42, %v3373_v3  ;;  %v763_v57 = vpop.f32.mrb[14].mxu1  ;;  %v712_v58 = vpop.f32.mrb[15].mxu0 }
 0x112   : > { %v878_v47 = vpack.c.bf16 %v3440_v39, %v3430_v35  ;;  %v709_v49 = vadd.f32 %v708_v43, %v3373_v3  ;;  %980 = vmatprep.subr.bf16.mxu1 %v883_v40  ;;  %v762_v54 = vadd.f32 %v761_v50, %v3373_v3  ;;  %v711_v55 = vadd.f32 %v710_v51, %v3386_v36  ;;  %v765_v3 = vpop.f32.mrb[15].mxu1  ;;  %v3498_v35 = vpop.permute.xlu1 %895 }
 0x113   : > { %vm788_vm13 = vcmp.gt.f32.partialorder %v707_v41, 0.0  ;;  %v820_v52 = vmul.f32 0.01, %v707_v41  ;;  %v815_v59 = vmul.f32 0.01, %v3425_v29  ;;  %981 = vmatpush1.bf16.msra.mxu1 %v882_v61  ;;  %2860 = vmatmul.mubr.msk.bf16.vlgmr.msra.gmra.mrb[16].mxu0 %vm918_vm4, %v3436_v45  ;;  %vm790_vm14 = vcmp.gt.f32.partialorder %v760_v48, 0.0 }
 0x114   : > { %v822_v60 = vmul.f32 0.01, %v760_v48  ;;  %vm789_vm15 = vcmp.gt.f32.partialorder %v709_v49, 0.0  ;;  %v821_v63 = vmul.f32 0.01, %v709_v49  ;;  %vm791_vm2 = vcmp.gt.f32.partialorder %v762_v54, 0.0  ;;  %967 = vmatprep.mubr.bf16.mxu0 %v3112_v0 }
 0x115   : > { %v852_v62 = vsel %vm788_vm13, %v707_v41, %v820_v52  ;;  %vm796_vm3 = vcmp.gt.f32.partialorder %v711_v55, 0.0  ;;  %v823_v1 = vmul.f32 0.01, %v762_v54  ;;  %v828_v2 = vmul.f32 0.01, %v711_v55 }
 0x116   : > { %v764_v4 = vadd.f32 %v763_v57, %v3386_v36  ;;  %v713_v53 = vadd.f32 %v712_v58, %v3386_v36  ;;  %2862 = vmatmul.mubr.msk.bf16.vlgmr.msra.gmra.mrb[16].mxu1 %vm918_vm4, %v3436_v45  ;;  %v854_v56 = vsel %vm790_vm14, %v760_v48, %v822_v60  ;;  %v766_v61 = vadd.f32 %v765_v3, %v3386_v36 }
 0x117   : > { %v837_v7 = vsel %vm773_vm7, %v3404_v5, %v3414_v18  ;;  %v845_v8 = vsel %vm781_vm11, %v703_v28, %v813_v37  ;;  %v860_v11 = vsel %vm796_vm3, %v711_v55, %v828_v2  ;;  %1020 = vmatprep.mubr.bf16.mxu1 %v3112_v0  ;;  %v839_v5 = vsel %vm775_vm8, %v3407_v6, %v3419_v19  ;;  %v3495_v6 = vpop.permute.xlu0 %890 }
 0x118   : > { %vm798_vm5 = vcmp.gt.f32.partialorder %v764_v4, 0.0  ;;  %v830_v12 = vmul.f32 0.01, %v764_v4  ;;  %vm797_vm6 = vcmp.gt.f32.partialorder %v713_v53, 0.0  ;;  %v884_v14 = vpack.c.bf16 %v860_v11, %v852_v62 }
 0x119   : > { %v829_v15 = vmul.f32 0.01, %v713_v53  ;;  %vm799_vm9 = vcmp.gt.f32.partialorder %v766_v61, 0.0  ;;  %v831_v36 = vmul.f32 0.01, %v766_v61  ;;  %v877_v21 = vpack.c.bf16 %v845_v8, %v837_v7 }
 0x11a   : > { %v862_v44 = vsel %vm798_vm5, %v764_v4, %v830_v12  ;;  %v847_v18 = vsel %vm783_vm12, %v3425_v29, %v815_v59  ;;  %v853_v24 = vsel %vm789_vm15, %v709_v49, %v821_v63  ;;  %v855_v31 = vsel %vm791_vm2, %v762_v54, %v823_v1 }
 0x11b   : > { %v886_v22 = vpack.c.bf16 %v862_v44, %v854_v56  ;;  %v879_v23 = vpack.c.bf16 %v847_v18, %v839_v5  ;;  %v861_v28 = vsel %vm797_vm6, %v713_v53, %v829_v15  ;;  %1031 = vmatprep.subr.bf16.mxu0 %v877_v21  ;;  %2861 = vmatmul.mubr.msk.bf16.gmra.mrb[20].mxu0 %vm918_vm4, %v3007_v13  ;;  %v3506_v59 = vpop.permute.xlu0 %900  ;;  %v3515_v44 = vpop.permute.xlu1 %905 }
 0x11c   : > { %v885_v30 = vpack.c.bf16 %v861_v28, %v853_v24  ;;  %v863_v32 = vsel %vm799_vm9, %v766_v61, %v831_v36  ;;  %1032 = vmatpush1.bf16.msra.mxu0 %v876_v46  ;;  %1063 = vmatprep.mubr.bf16.mxu0 %v3112_v0 }
 0x11d   : > { %1084 = vmatprep.subr.bf16.mxu1 %v879_v23  ;;  %v887_v33 = vpack.c.bf16 %v863_v32, %v855_v31 }
 0x11e   : > { %1085 = vmatpush1.bf16.msra.mxu1 %v878_v47  ;;  %1033 = vmatprep.subr.bf16.mxu0 %v885_v30 }
 0x11f   : > { %2863 = vmatmul.mubr.msk.bf16.gmra.mrb[20].mxu1 %vm918_vm4, %v3007_v13  ;;  %1086 = vmatprep.subr.bf16.mxu1 %v887_v33 }
 0x120   : > { %1116 = vmatprep.mubr.bf16.mxu1 %v3112_v0  ;;  %1034 = vmatpush1.bf16.msra.mxu0 %v884_v14 }
 0x122   : > { %1087 = vmatpush1.bf16.msra.mxu1 %v886_v22 }
 0x123   : > { %2864 = vmatmul.mubr.msk.bf16.vlgmr.msra.gmra.mrb[24].mxu0 %vm918_vm4, %v3436_v45 }
 0x124   : > { %1073 = vmatprep.mubr.bf16.mxu0 %v3112_v0 }
 0x127   : > { %2866 = vmatmul.mubr.msk.bf16.vlgmr.msra.gmra.mrb[24].mxu1 %vm918_vm4, %v3436_v45 }
 0x128   : > { %1126 = vmatprep.mubr.bf16.mxu1 %v3112_v0 }
 0x12b   : > { %2865 = vmatmul.mubr.msk.bf16.gmra.mrb[28].mxu0 %vm918_vm4, %v3007_v13 }
 0x12c   : > { %1309 = vmatprep.mubr.bf16.mxu0 %v3112_v0 }
 0x12f   : > { %2867 = vmatmul.mubr.msk.bf16.gmra.mrb[28].mxu1 %vm918_vm4, %v3007_v13 }
 0x130   : > { %1362 = vmatprep.mubr.bf16.mxu1 %v3112_v0 }
 0x1e6   : > { %v959_v19 = vpop.f32.mrb[16].mxu0 }
 0x1e7   : > { %v960_v29 = vadd.f32 %v959_v19, %v3495_v6  ;;  %v961_v34 = vpop.f32.mrb[17].mxu0 }
 0x1e8   : > { %v962_v37 = vadd.f32 %v961_v34, %v3495_v6  ;;  %v963_v45 = vpop.f32.mrb[18].mxu0 }
 0x1e9   : > { %v1169_v38 = vmul.f32 0.01, %v960_v29  ;;  %v1012_v39 = vpop.f32.mrb[16].mxu1  ;;  %v964_v40 = vadd.f32 %v963_v45, %v3498_v35  ;;  %v965_v41 = vpop.f32.mrb[19].mxu0  ;;  %vm1137_vm7 = vcmp.gt.f32.partialorder %v960_v29, 0.0 }
 0x1ea   : > { %v1013_v42 = vadd.f32 %v1012_v39, %v3495_v6  ;;  %v1014_v43 = vpop.f32.mrb[17].mxu1  ;;  %v966_v46 = vadd.f32 %v965_v41, %v3498_v35  ;;  %v1170_v47 = vmul.f32 0.01, %v962_v37  ;;  %vm1138_vm10 = vcmp.gt.f32.partialorder %v962_v37, 0.0 }
 0x1eb   : > { %v1015_v48 = vadd.f32 %v1014_v43, %v3495_v6  ;;  %vm1145_vm8 = vcmp.gt.f32.partialorder %v964_v40, 0.0  ;;  %v1177_v49 = vmul.f32 0.01, %v964_v40  ;;  %v1016_v50 = vpop.f32.mrb[18].mxu1  ;;  %v1201_v55 = vsel %vm1137_vm7, %v960_v29, %v1169_v38 }
 0x1ec   : > { %v1171_v51 = vmul.f32 0.01, %v1013_v42  ;;  %v1017_v52 = vadd.f32 %v1016_v50, %v3498_v35  ;;  %vm1146_vm11 = vcmp.gt.f32.partialorder %v966_v46, 0.0  ;;  %v1018_v54 = vpop.f32.mrb[19].mxu1  ;;  %vm1139_vm12 = vcmp.gt.f32.partialorder %v1013_v42, 0.0 }
 0x1ed   : > { %v1209_v57 = vsel %vm1145_vm8, %v964_v40, %v1177_v49  ;;  %v1178_v58 = vmul.f32 0.01, %v966_v46  ;;  %v1172_v60 = vmul.f32 0.01, %v1015_v48  ;;  %v1019_v1 = vadd.f32 %v1018_v54, %v3498_v35 }
 0x1ee   : > { %v1245_v62 = vpack.c.bf16 %v1209_v57, %v1201_v55  ;;  %vm1147_vm13 = vcmp.gt.f32.partialorder %v1017_v52, 0.0  ;;  %v1179_v63 = vmul.f32 0.01, %v1017_v52  ;;  %v969_v3 = vpop.f32.mrb[20].mxu0  ;;  %v1202_v53 = vsel %vm1138_vm10, %v962_v37, %v1170_v47 }
 0x1ef   : > { %v970_v2 = vadd.f32 %v969_v3, %v3506_v59  ;;  %v971_v4 = vpop.f32.mrb[21].mxu0  ;;  %v1210_v56 = vsel %vm1146_vm11, %v966_v46, %v1178_v58  ;;  %v1203_v61 = vsel %vm1139_vm12, %v1013_v42, %v1171_v51  ;;  %vm1140_vm14 = vcmp.gt.f32.partialorder %v1015_v48, 0.0 }
 0x1f0   : > { %v1211_v7 = vsel %vm1147_vm13, %v1017_v52, %v1179_v63  ;;  %v973_v8 = vpop.f32.mrb[22].mxu0  ;;  %v1246_v11 = vpack.c.bf16 %v1210_v56, %v1202_v53  ;;  %vm1148_vm15 = vcmp.gt.f32.partialorder %v1019_v1, 0.0  ;;  %v1180_v13 = vmul.f32 0.01, %v1019_v1 }
 0x1f1   : > { %v1247_v12 = vpack.c.bf16 %v1211_v7, %v1203_v61  ;;  %v3513_v15 = vadd.f32 %v971_v4, %v3506_v59  ;;  %v975_v36 = vpop.f32.mrb[23].mxu0  ;;  %vm1153_vm2 = vcmp.gt.f32.partialorder %v970_v2, 0.0  ;;  %v1185_v21 = vmul.f32 0.01, %v970_v2 }
 0x1f2   : > { %v1022_v14 = vpop.f32.mrb[20].mxu1  ;;  %1277 = vmatprep.subr.bf16.mxu0 %v1246_v11  ;;  %v974_v23 = vadd.f32 %v973_v8, %v3515_v44  ;;  %v3523_v28 = vadd.f32 %v975_v36, %v3515_v44  ;;  %v1204_v30 = vsel %vm1140_vm14, %v1015_v48, %v1172_v60  ;;  %v1212_v19 = vsel %vm1148_vm15, %v1019_v1, %v1180_v13 }
 0x1f3   : > { %v1023_v5 = vadd.f32 %v1022_v14, %v3506_v59  ;;  %v1024_v18 = vpop.f32.mrb[21].mxu1  ;;  %1278 = vmatpush1.bf16.msra.mxu0 %v1245_v62  ;;  %v3529_v29 = vsel %vm1153_vm2, %v970_v2, %v1185_v21  ;;  %vm1154_vm5 = vcmp.gt.f32.partialorder %v3513_v15, 0.0  ;;  %v1186_v34 = vmul.f32 0.01, %v3513_v15 }
 0x1f4   : > { %v3519_v22 = vadd.f32 %v1024_v18, %v3506_v59  ;;  %v1026_v24 = vpop.f32.mrb[22].mxu1  ;;  %vm1161_vm6 = vcmp.gt.f32.partialorder %v974_v23, 0.0  ;;  %v1193_v37 = vmul.f32 0.01, %v974_v23  ;;  %vm1162_vm8 = vcmp.gt.f32.partialorder %v3523_v28, 0.0 }
 0x1f5   : > { %vm1155_vm3 = vcmp.gt.f32.partialorder %v1023_v5, 0.0  ;;  %v1187_v31 = vmul.f32 0.01, %v1023_v5  ;;  %v1027_v32 = vadd.f32 %v1026_v24, %v3515_v44  ;;  %v1028_v33 = vpop.f32.mrb[23].mxu1  ;;  %v1248_v43 = vpack.c.bf16 %v1212_v19, %v1204_v30 }
 0x1f6   : > { %vm1156_vm9 = vcmp.gt.f32.partialorder %v3519_v22, 0.0  ;;  %v1188_v38 = vmul.f32 0.01, %v3519_v22  ;;  %v1065_v40 = vpop.f32.mrb[24].mxu0  ;;  %v3537_v41 = vsel %vm1161_vm6, %v974_v23, %v1193_v37  ;;  %v1029_v42 = vadd.f32 %v1028_v33, %v3515_v44 }
 0x1f7   : > { %v3533_v45 = vsel %vm1155_vm3, %v1023_v5, %v1187_v31  ;;  %vm1163_vm7 = vcmp.gt.f32.partialorder %v1027_v32, 0.0  ;;  %v1195_v39 = vmul.f32 0.01, %v1027_v32  ;;  %v1067_v46 = vpop.f32.mrb[25].mxu0  ;;  %v1253_v47 = vpack.c.bf16 %v3537_v41, %v3529_v29  ;;  %1330 = vmatprep.subr.bf16.mxu1 %v1248_v43 }
 0x1f8   : > { %v1066_v49 = vadd.f32 %v1065_v40, %v3495_v6  ;;  %v3547_v50 = vadd.f32 %v1067_v46, %v3495_v6  ;;  %v1069_v51 = vpop.f32.mrb[26].mxu0  ;;  %v1194_v54 = vmul.f32 0.01, %v3523_v28  ;;  %vm1164_vm10 = vcmp.gt.f32.partialorder %v1029_v42, 0.0  ;;  %1331 = vmatpush1.bf16.msra.mxu1 %v1247_v12 }
 0x1f9   : > { %v3543_v48 = vsel %vm1163_vm7, %v1027_v32, %v1195_v39  ;;  %v1070_v57 = vadd.f32 %v1069_v51, %v3498_v35  ;;  %v1071_v58 = vpop.f32.mrb[27].mxu0  ;;  %v1196_v60 = vmul.f32 0.01, %v1029_v42  ;;  %v1218_v30 = vsel %vm1154_vm5, %v3513_v15, %v1186_v34 }
 0x1fa   : > { %v1255_v52 = vpack.c.bf16 %v3543_v48, %v3533_v45  ;;  %v1118_v55 = vpop.f32.mrb[24].mxu1  ;;  %vm1141_vm11 = vcmp.gt.f32.partialorder %v1066_v49, 0.0  ;;  %v1173_v62 = vmul.f32 0.01, %v1066_v49  ;;  %vm1142_vm12 = vcmp.gt.f32.partialorder %v3547_v50, 0.0 }
 0x1fb   : > { %v1119_v63 = vadd.f32 %v1118_v55, %v3495_v6  ;;  %v1120_v3 = vpop.f32.mrb[25].mxu1  ;;  %vm1149_vm13 = vcmp.gt.f32.partialorder %v1070_v57, 0.0  ;;  %v1181_v2 = vmul.f32 0.01, %v1070_v57  ;;  %v1174_v56 = vmul.f32 0.01, %v3547_v50 }
 0x1fc   : > { %v3556_v1 = vadd.f32 %v1120_v3, %v3495_v6  ;;  %v1122_v4 = vpop.f32.mrb[26].mxu1  ;;  %v3560_v8 = vsel %vm1141_vm11, %v1066_v49, %v1173_v62  ;;  %v1072_v12 = vadd.f32 %v1071_v58, %v3498_v35  ;;  %v1226_v31 = vsel %vm1162_vm8, %v3523_v28, %v1194_v54  ;;  %v3592_v49 = vld [vmem:[%s4072_s6] sm:$0xff]  }
 0x1fd   : > { %vm1143_vm14 = vcmp.gt.f32.partialorder %v1119_v63, 0.0  ;;  %v1175_v53 = vmul.f32 0.01, %v1119_v63  ;;  %v1123_v61 = vadd.f32 %v1122_v4, %v3498_v35  ;;  %v1124_v7 = vpop.f32.mrb[27].mxu1  ;;  %v3563_v11 = vsel %vm1149_vm13, %v1070_v57, %v1181_v2 }
 0x1fe   : > { %vm1144_vm15 = vcmp.gt.f32.partialorder %v3556_v1, 0.0  ;;  %v1176_v6 = vmul.f32 0.01, %v3556_v1  ;;  %v1249_v13 = vpack.c.bf16 %v3563_v11, %v3560_v8  ;;  %v1075_v36 = vpop.f32.mrb[28].mxu0  ;;  %vm1150_vm3 = vcmp.gt.f32.partialorder %v1072_v12, 0.0 }
 0x1ff   : > { %vm1151_vm2 = vcmp.gt.f32.partialorder %v1123_v61, 0.0  ;;  %v1183_v14 = vmul.f32 0.01, %v1123_v61  ;;  %v3569_v21 = vsel %vm1143_vm14, %v1119_v63, %v1175_v53  ;;  %v1182_v5 = vmul.f32 0.01, %v1072_v12  ;;  %v1077_v23 = vpop.f32.mrb[29].mxu0 }
 0x200   : > { %v1125_v18 = vadd.f32 %v1124_v7, %v3498_v35  ;;  %v1228_v32 = vsel %vm1164_vm10, %v1029_v42, %v1196_v60  ;;  %v1079_v33 = vpop.f32.mrb[30].mxu0  ;;  %v1254_v37 = vpack.c.bf16 %v1226_v31, %v1218_v30  ;;  %v1220_v35 = vsel %vm1156_vm9, %v3519_v22, %v1188_v38 }
 0x201   : > { %v3572_v24 = vsel %vm1151_vm2, %v1123_v61, %v1183_v14  ;;  %v1081_v40 = vpop.f32.mrb[31].mxu0  ;;  %v1256_v43 = vpack.c.bf16 %v1228_v32, %v1220_v35  ;;  %v1076_v15 = vadd.f32 %v1075_v36, %v3506_v59  ;;  %v1078_v28 = vadd.f32 %v1077_v23, %v3506_v59 }
 0x202   : > { %v1251_v19 = vpack.c.bf16 %v3572_v24, %v3569_v21  ;;  %vm1152_vm6 = vcmp.gt.f32.partialorder %v1125_v18, 0.0  ;;  %v1128_v39 = vpop.f32.mrb[28].mxu1  ;;  %v1184_v46 = vmul.f32 0.01, %v1125_v18  ;;  %1279 = vmatprep.subr.bf16.mxu0 %v1254_v37  ;;  %v1080_v22 = vadd.f32 %v1079_v33, %v3515_v44 }
 0x203   : > { %v1129_v34 = vadd.f32 %v1128_v39, %v3506_v59  ;;  %v1130_v42 = vpop.f32.mrb[29].mxu1  ;;  %v1082_v54 = vadd.f32 %v1081_v40, %v3515_v44  ;;  %1332 = vmatprep.subr.bf16.mxu1 %v1256_v43  ;;  %1280 = vmatpush1.bf16.msra.mxu0 %v1253_v47  ;;  %vm1157_vm5 = vcmp.gt.f32.partialorder %v1076_v15, 0.0  ;;  %v1189_v55 = vmul.f32 0.01, %v1076_v15 }
 0x204   : > { %v1131_v51 = vadd.f32 %v1130_v42, %v3506_v59  ;;  %v1132_v38 = vpop.f32.mrb[30].mxu1  ;;  %v1206_v57 = vsel %vm1142_vm12, %v3547_v50, %v1174_v56  ;;  %1333 = vmatpush1.bf16.msra.mxu1 %v1255_v52  ;;  %vm1158_vm7 = vcmp.gt.f32.partialorder %v1078_v28, 0.0  ;;  %v1190_v58 = vmul.f32 0.01, %v1078_v28 }
 0x205   : > { %vm1159_vm9 = vcmp.gt.f32.partialorder %v1129_v34, 0.0  ;;  %v1191_v59 = vmul.f32 0.01, %v1129_v34  ;;  %v1221_v60 = vsel %vm1157_vm5, %v1076_v15, %v1189_v55  ;;  %vm1165_vm10 = vcmp.gt.f32.partialorder %v1080_v22, 0.0  ;;  %v1134_v41 = vpop.f32.mrb[31].mxu1 }
 0x206   : > { %vm1160_vm8 = vcmp.gt.f32.partialorder %v1131_v51, 0.0  ;;  %v1192_v62 = vmul.f32 0.01, %v1131_v51  ;;  %v1197_v29 = vmul.f32 0.01, %v1080_v22  ;;  %2870 = vmatmul.mubr.msk.bf16.vlgmr.msra.gmra.mrb[32].mxu0 %vm918_vm4, %v3592_v49  ;;  %v1133_v47 = vadd.f32 %v1132_v38, %v3515_v44 }
 0x207   : > { %vm1166_vm11 = vcmp.gt.f32.partialorder %v1082_v54, 0.0  ;;  %v1198_v50 = vmul.f32 0.01, %v1082_v54  ;;  %v1135_v63 = vadd.f32 %v1134_v41, %v3515_v44  ;;  %2872 = vmatmul.mubr.msk.bf16.vlgmr.msra.gmra.mrb[32].mxu1 %vm918_vm4, %v3592_v49  ;;  %v1214_v48 = vsel %vm1150_vm3, %v1072_v12, %v1182_v5  ;;  %1319 = vmatprep.mubr.bf16.mxu0 %v3112_v0 }
 0x208   : > { %v1229_v45 = vsel %vm1165_vm10, %v1080_v22, %v1197_v29  ;;  %v1208_v52 = vsel %vm1144_vm15, %v3556_v1, %v1176_v6  ;;  %v1216_v3 = vsel %vm1152_vm6, %v1125_v18, %v1184_v46  ;;  %vm1167_vm12 = vcmp.gt.f32.partialorder %v1133_v47, 0.0  ;;  %1372 = vmatprep.mubr.bf16.mxu1 %v3112_v0  ;;  %v3009_v1 = vld [vmem:[%s4072_s6 + $0x8] sm:$0xff]  }
 0x209   : > { %v1257_v2 = vpack.c.bf16 %v1229_v45, %v1221_v60  ;;  %v1199_v4 = vmul.f32 0.01, %v1133_v47  ;;  %vm1168_vm13 = vcmp.gt.f32.partialorder %v1135_v63, 0.0  ;;  %v1223_v44 = vsel %vm1159_vm9, %v1129_v34, %v1191_v59 }
 0x20a   : > { %v1200_v53 = vmul.f32 0.01, %v1135_v63  ;;  %v1250_v56 = vpack.c.bf16 %v1214_v48, %v1206_v57  ;;  %v1252_v61 = vpack.c.bf16 %v1216_v3, %v1208_v52  ;;  %v1222_v12 = vsel %vm1158_vm7, %v1078_v28, %v1190_v58 }
 0x20b   : > { %v1231_v7 = vsel %vm1167_vm12, %v1133_v47, %v1199_v4  ;;  %v1230_v6 = vsel %vm1166_vm11, %v1082_v54, %v1198_v50  ;;  %v1224_v14 = vsel %vm1160_vm8, %v1131_v51, %v1192_v62 }
 0x20c   : > { %v1259_v36 = vpack.c.bf16 %v1231_v7, %v1223_v44  ;;  %1383 = vmatprep.subr.bf16.mxu0 %v1250_v56  ;;  %1436 = vmatprep.subr.bf16.mxu1 %v1252_v61  ;;  %v1258_v5 = vpack.c.bf16 %v1230_v6, %v1222_v12  ;;  %v1232_v18 = vsel %vm1168_vm13, %v1135_v63, %v1200_v53 }
 0x20d   : > { %1384 = vmatpush1.bf16.msra.mxu0 %v1249_v13  ;;  %1437 = vmatpush1.bf16.msra.mxu1 %v1251_v19  ;;  %v1260_v23 = vpack.c.bf16 %v1232_v18, %v1224_v14 }
 0x20e   : > { %1385 = vmatprep.subr.bf16.mxu0 %v1258_v5  ;;  %2871 = vmatmul.mubr.msk.bf16.gmra.mrb[36].mxu0 %vm918_vm4, %v3009_v1 }
 0x20f   : > { %1438 = vmatprep.subr.bf16.mxu1 %v1260_v23  ;;  %2873 = vmatmul.mubr.msk.bf16.gmra.mrb[36].mxu1 %vm918_vm4, %v3009_v1 }
 0x210   : > { %1415 = vmatprep.mubr.bf16.mxu0 %v3112_v0  ;;  %1468 = vmatprep.mubr.bf16.mxu1 %v3112_v0 }
 0x211   : > { %1386 = vmatpush1.bf16.msra.mxu0 %v1257_v2  ;;  %1439 = vmatpush1.bf16.msra.mxu1 %v1259_v36 }
 0x212   : > { %2880 = vmatprep.subr.msk.bf16.mxu0 %vm531_vm0, %v3260_v9  ;;  %2883 = vmatprep.subr.msk.bf16.mxu1 %vm531_vm0, %v3262_v10  ;;  %v3010_v9 = vld [vmem:[%s4071_s5] sm:$0xff]   ;;  %v3011_v10 = vld [vmem:[%s4071_s5 + $0x8] sm:$0xff]  }
 0x216   : > { %2874 = vmatmul.mubr.msk.bf16.vlgmr.msra.gmra.mrb[40].mxu0 %vm918_vm4, %v3592_v49 }
 0x217   : > { %2876 = vmatmul.mubr.msk.bf16.vlgmr.msra.gmra.mrb[40].mxu1 %vm918_vm4, %v3592_v49  ;;  %1506 = vmatpush1.bf16.msra.mxu0 %v3273_v20 }
 0x218   : > { %1559 = vmatpush1.bf16.msra.mxu1 %v3283_v25  ;;  %1425 = vmatprep.mubr.bf16.mxu0 %v3112_v0 }
 0x219   : > { %1478 = vmatprep.mubr.bf16.mxu1 %v3112_v0  ;;  %2886 = vmatprep.subr.msk.bf16.mxu0 %vm531_vm0, %v3264_v16  ;;  %v3681_v16 = vpop.permute.xlu0 %1719 }
 0x21a   : > { %2889 = vmatprep.subr.msk.bf16.mxu1 %vm531_vm0, %v3266_v17  ;;  %v3683_v17 = vpop.permute.xlu1 %1724 }
 0x21d   : > { %v3695_v22 = vpop.permute.xlu0 %1729 }
 0x21e   : > { %2875 = vmatmul.mubr.msk.bf16.gmra.mrb[44].mxu0 %vm918_vm4, %v3009_v1  ;;  %v3705_v4 = vpop.permute.xlu1 %1734 }
 0x21f   : > { %2877 = vmatmul.mubr.msk.bf16.gmra.mrb[44].mxu1 %vm918_vm4, %v3009_v1  ;;  %1537 = vmatprep.mubr.bf16.mxu0 %v3112_v0 }
 0x220   : > { %1590 = vmatprep.mubr.bf16.mxu1 %v3112_v0 }
 0x226   : > { %2881 = vmatmul.mubr.msk.bf16.vlgmr.msra.gmra.mrb[32].mxu0 %vm524_vm1, %v3010_v9 }
 0x227   : > { %2884 = vmatmul.mubr.msk.bf16.vlgmr.msra.gmra.mrb[32].mxu1 %vm524_vm1, %v3010_v9  ;;  %1612 = vmatpush1.bf16.msra.mxu0 %v3289_v26 }
 0x228   : > { %1665 = vmatpush1.bf16.msra.mxu1 %v3292_v27  ;;  %1547 = vmatprep.mubr.bf16.mxu0 %v3112_v0 }
 0x229   : > { %1600 = vmatprep.mubr.bf16.mxu1 %v3112_v0 }
 0x22e   : > { %2882 = vmatmul.mubr.msk.bf16.gmra.mrb[36].mxu0 %vm524_vm1, %v3011_v10 }
 0x22f   : > { %2885 = vmatmul.mubr.msk.bf16.gmra.mrb[36].mxu1 %vm524_vm1, %v3011_v10  ;;  %1643 = vmatprep.mubr.bf16.mxu0 %v3112_v0 }
 0x230   : > { %1696 = vmatprep.mubr.bf16.mxu1 %v3112_v0 }
 0x236   : > { %2887 = vmatmul.mubr.msk.bf16.vlgmr.msra.gmra.mrb[40].mxu0 %vm524_vm1, %v3010_v9 }
 0x237   : > { %2890 = vmatmul.mubr.msk.bf16.vlgmr.msra.gmra.mrb[40].mxu1 %vm524_vm1, %v3010_v9  ;;  %1653 = vmatprep.mubr.bf16.mxu0 %v3112_v0 }
 0x238   : > { %1706 = vmatprep.mubr.bf16.mxu1 %v3112_v0 }
 0x23e   : > { %2888 = vmatmul.mubr.msk.bf16.gmra.mrb[44].mxu0 %vm524_vm1, %v3011_v10 }
 0x23f   : > { %2891 = vmatmul.mubr.msk.bf16.gmra.mrb[44].mxu1 %vm524_vm1, %v3011_v10  ;;  %1957 = vmatprep.mubr.bf16.mxu0 %v3112_v0 }
 0x240   : > { %2010 = vmatprep.mubr.bf16.mxu1 %v3112_v0 }
 0x2f9   : > { %v1539_v20 = vpop.f32.mrb[32].mxu0 }
 0x2fa   : > { %v1737_v25 = vadd.f32 %v3681_v16, %v1539_v20  ;;  %v1592_v26 = vpop.f32.mrb[32].mxu1  ;;  %v1541_v27 = vpop.f32.mrb[33].mxu0 }
 0x2fb   : > { %v1739_v8 = vadd.f32 %v3681_v16, %v1592_v26  ;;  %v1738_v11 = vadd.f32 %v3681_v16, %v1541_v27  ;;  %v1594_v13 = vpop.f32.mrb[33].mxu1  ;;  %v1543_v21 = vpop.f32.mrb[34].mxu0 }
 0x2fc   : > { %v1801_v24 = vmul.f32 0.01, %v1737_v25  ;;  %v1740_v30 = vadd.f32 %v3681_v16, %v1594_v13  ;;  %v1745_v31 = vadd.f32 %v3683_v17, %v1543_v21  ;;  %v1596_v32 = vpop.f32.mrb[34].mxu1  ;;  %v1545_v33 = vpop.f32.mrb[35].mxu0  ;;  %vm1769_vm0 = vcmp.gt.f32.partialorder %v1737_v25, 0.0 }
 0x2fd   : > { %v1803_v19 = vmul.f32 0.01, %v1739_v8  ;;  %vm1771_vm1 = vcmp.gt.f32.partialorder %v1739_v8, 0.0  ;;  %vm1770_vm14 = vcmp.gt.f32.partialorder %v1738_v11, 0.0  ;;  %v1802_v37 = vmul.f32 0.01, %v1738_v11 }
 0x2fe   : > { %vm1777_vm15 = vcmp.gt.f32.partialorder %v1745_v31, 0.0  ;;  %v1598_v35 = vpop.f32.mrb[35].mxu1  ;;  %v1804_v39 = vmul.f32 0.01, %v1740_v30  ;;  %v1809_v40 = vmul.f32 0.01, %v1745_v31  ;;  %v1747_v43 = vadd.f32 %v3683_v17, %v1596_v32 }
 0x2ff   : > { %v1746_v15 = vadd.f32 %v3683_v17, %v1545_v33  ;;  %v1833_v34 = vsel %vm1769_vm0, %v1737_v25, %v1801_v24  ;;  %vm1772_vm2 = vcmp.gt.f32.partialorder %v1740_v30, 0.0  ;;  %v1748_v28 = vadd.f32 %v3683_v17, %v1598_v35 }
 0x300   : > { %v3693_v42 = vsel %vm1771_vm1, %v1739_v8, %v1803_v19  ;;  %v1841_v46 = vsel %vm1777_vm15, %v1745_v31, %v1809_v40  ;;  %vm1779_vm3 = vcmp.gt.f32.partialorder %v1747_v43, 0.0  ;;  %v1811_v49 = vmul.f32 0.01, %v1747_v43 }
 0x301   : > { %v1549_v51 = vpop.f32.mrb[36].mxu0  ;;  %v1873_v38 = vpack.c.bf16 %v1841_v46, %v1833_v34  ;;  %vm1778_vm6 = vcmp.gt.f32.partialorder %v1746_v15, 0.0  ;;  %v1810_v54 = vmul.f32 0.01, %v1746_v15  ;;  %v1834_v57 = vsel %vm1770_vm14, %v1738_v11, %v1802_v37 }
 0x302   : > { %v1602_v55 = vpop.f32.mrb[36].mxu1  ;;  %v1843_v59 = vsel %vm1779_vm3, %v1747_v43, %v1811_v49  ;;  %v1753_v58 = vadd.f32 %v3695_v22, %v1549_v51  ;;  %v1551_v62 = vpop.f32.mrb[37].mxu0  ;;  %v1836_v41 = vsel %vm1772_vm2, %v1740_v30, %v1804_v39  ;;  %v1812_v50 = vmul.f32 0.01, %v1748_v28 }
 0x303   : > { %v1755_v60 = vadd.f32 %v3695_v22, %v1602_v55  ;;  %v1604_v29 = vpop.f32.mrb[37].mxu1  ;;  %v1875_v47 = vpack.c.bf16 %v1843_v59, %v3693_v42  ;;  %v1754_v63 = vadd.f32 %v3695_v22, %v1551_v62  ;;  %v1553_v48 = vpop.f32.mrb[38].mxu0  ;;  %vm1780_vm5 = vcmp.gt.f32.partialorder %v1748_v28, 0.0 }
 0x304   : > { %v1756_v45 = vadd.f32 %v3695_v22, %v1604_v29  ;;  %v1606_v52 = vpop.f32.mrb[38].mxu1  ;;  %vm1785_vm9 = vcmp.gt.f32.partialorder %v1753_v58, 0.0  ;;  %v1817_v3 = vmul.f32 0.01, %v1753_v58  ;;  %v1842_v2 = vsel %vm1778_vm6, %v1746_v15, %v1810_v54  ;;  %v1555_v1 = vpop.f32.mrb[39].mxu0 }
 0x305   : > { %vm1787_vm7 = vcmp.gt.f32.partialorder %v1755_v60, 0.0  ;;  %v1819_v44 = vmul.f32 0.01, %v1755_v60  ;;  %vm1786_vm8 = vcmp.gt.f32.partialorder %v1754_v63, 0.0  ;;  %v1818_v53 = vmul.f32 0.01, %v1754_v63 }
 0x306   : > { %vm1788_vm10 = vcmp.gt.f32.partialorder %v1756_v45, 0.0  ;;  %v1820_v56 = vmul.f32 0.01, %v1756_v45  ;;  %v1761_v61 = vadd.f32 %v3705_v4, %v1553_v48  ;;  %v1763_v7 = vadd.f32 %v3705_v4, %v1606_v52  ;;  %v1608_v12 = vpop.f32.mrb[39].mxu1 }
 0x307   : > { %v1762_v6 = vadd.f32 %v3705_v4, %v1555_v1  ;;  %v1764_v14 = vadd.f32 %v3705_v4, %v1608_v12  ;;  %v1874_v36 = vpack.c.bf16 %v1842_v2, %v1834_v57  ;;  %v1844_v5 = vsel %vm1780_vm5, %v1748_v28, %v1812_v50 }
 0x308   : > { %vm1793_vm11 = vcmp.gt.f32.partialorder %v1761_v61, 0.0  ;;  %v1825_v18 = vmul.f32 0.01, %v1761_v61  ;;  %vm1795_vm12 = vcmp.gt.f32.partialorder %v1763_v7, 0.0  ;;  %v1827_v23 = vmul.f32 0.01, %v1763_v7 }
 0x309   : > { %v1849_v9 = vsel %vm1785_vm9, %v1753_v58, %v1817_v3  ;;  %v3714_v10 = vsel %vm1787_vm7, %v1755_v60, %v1819_v44  ;;  %vm1794_vm13 = vcmp.gt.f32.partialorder %v1762_v6, 0.0  ;;  %v1826_v20 = vmul.f32 0.01, %v1762_v6  ;;  %1925 = vmatprep.subr.bf16.mxu0 %v1874_v36  ;;  %v1645_v8 = vpop.f32.mrb[40].mxu0 }
 0x30a   : > { %v1857_v25 = vsel %vm1793_vm11, %v1761_v61, %v1825_v18  ;;  %v3716_v26 = vsel %vm1795_vm12, %v1763_v7, %v1827_v23  ;;  %vm1796_vm0 = vcmp.gt.f32.partialorder %v1764_v14, 0.0  ;;  %v1876_v27 = vpack.c.bf16 %v1844_v5, %v1836_v41  ;;  %1926 = vmatpush1.bf16.msra.mxu0 %v1873_v38  ;;  %v1698_v11 = vpop.f32.mrb[40].mxu1  ;;  %v1647_v31 = vpop.f32.mrb[41].mxu0 }
 0x30b   : > { %v1881_v13 = vpack.c.bf16 %v1857_v25, %v1849_v9  ;;  %v1883_v21 = vpack.c.bf16 %v3716_v26, %v3714_v10  ;;  %v1741_v24 = vadd.f32 %v3681_v16, %v1645_v8  ;;  %v1743_v30 = vadd.f32 %v3681_v16, %v1698_v11  ;;  %v1700_v32 = vpop.f32.mrb[41].mxu1  ;;  %v1649_v35 = vpop.f32.mrb[42].mxu0 }
 0x30c   : > { %v1828_v33 = vmul.f32 0.01, %v1764_v14  ;;  %1978 = vmatprep.subr.bf16.mxu1 %v1876_v27  ;;  %v3723_v19 = vadd.f32 %v3681_v16, %v1647_v31  ;;  %v3726_v37 = vadd.f32 %v3681_v16, %v1700_v32  ;;  %v1702_v39 = vpop.f32.mrb[42].mxu1  ;;  %v1850_v40 = vsel %vm1786_vm8, %v1754_v63, %v1818_v53  ;;  %v1651_v38 = vpop.f32.mrb[43].mxu0 }
 0x30d   : > { %1979 = vmatpush1.bf16.msra.mxu1 %v1875_v47  ;;  %vm1773_vm1 = vcmp.gt.f32.partialorder %v1741_v24, 0.0  ;;  %v1805_v43 = vmul.f32 0.01, %v1741_v24  ;;  %v1858_v15 = vsel %vm1794_vm13, %v1762_v6, %v1826_v20  ;;  %v1852_v34 = vsel %vm1788_vm10, %v1756_v45, %v1820_v56  ;;  %v1704_v54 = vpop.f32.mrb[43].mxu1 }
 0x30e   : > { %vm1775_vm14 = vcmp.gt.f32.partialorder %v1743_v30, 0.0  ;;  %v1807_v28 = vmul.f32 0.01, %v1743_v30  ;;  %vm1774_vm15 = vcmp.gt.f32.partialorder %v3723_v19, 0.0  ;;  %v3733_v42 = vmul.f32 0.01, %v3723_v19 }
 0x30f   : > { %v3735_v16 = vsel %vm1773_vm1, %v1741_v24, %v1805_v43  ;;  %v3738_v46 = vmul.f32 0.01, %v3726_v37  ;;  %v1749_v49 = vadd.f32 %v3683_v17, %v1649_v35  ;;  %v1751_v51 = vadd.f32 %v3683_v17, %v1702_v39 }
 0x310   : > { %v1750_v55 = vadd.f32 %v3683_v17, %v1651_v38  ;;  %v3744_v57 = vadd.f32 %v3683_v17, %v1704_v54  ;;  %v1882_v59 = vpack.c.bf16 %v1858_v15, %v1850_v40  ;;  %v1860_v58 = vsel %vm1796_vm0, %v1764_v14, %v1828_v33  ;;  %v3755_v17 = vld [vmem:[%s4074_s8] sm:$0xff]   ;;  %v3817_v54 = vpop.permute.xlu1 %1896 }
 0x311   : > { %v1655_v60 = vpop.f32.mrb[44].mxu0  ;;  %vm1776_vm2 = vcmp.gt.f32.partialorder %v3726_v37, 0.0  ;;  %vm1781_vm3 = vcmp.gt.f32.partialorder %v1749_v49, 0.0  ;;  %v1813_v62 = vmul.f32 0.01, %v1749_v49  ;;  %vm1783_vm6 = vcmp.gt.f32.partialorder %v1751_v51, 0.0 }
 0x312   : > { %v1815_v29 = vmul.f32 0.01, %v1751_v51  ;;  %v3749_v41 = vsel %vm1775_vm14, %v1743_v30, %v1807_v28  ;;  %vm1782_vm5 = vcmp.gt.f32.partialorder %v1750_v55, 0.0  ;;  %v1814_v47 = vmul.f32 0.01, %v1750_v55  ;;  %1927 = vmatprep.subr.bf16.mxu0 %v1882_v59  ;;  %v1708_v52 = vpop.f32.mrb[44].mxu1 }
 0x313   : > { %vm1784_vm9 = vcmp.gt.f32.partialorder %v3744_v57, 0.0  ;;  %v3757_v50 = vsel %vm1781_vm3, %v1749_v49, %v1813_v62  ;;  %v1884_v45 = vpack.c.bf16 %v1860_v58, %v1852_v34  ;;  %1928 = vmatpush1.bf16.msra.mxu0 %v1881_v13  ;;  %v1757_v48 = vadd.f32 %v3695_v22, %v1655_v60  ;;  %v1657_v3 = vpop.f32.mrb[45].mxu0  ;;  %v1710_v61 = vpop.f32.mrb[45].mxu1  ;;  %v3013_v30 = vld [vmem:[%s4074_s8 + $0x8] sm:$0xff]  }
 0x314   : > { %v3759_v63 = vsel %vm1783_vm6, %v1751_v51, %v1815_v29  ;;  %v1877_v2 = vpack.c.bf16 %v3757_v50, %v3735_v16  ;;  %v1759_v53 = vadd.f32 %v3695_v22, %v1708_v52  ;;  %v1758_v56 = vadd.f32 %v3695_v22, %v1657_v3  ;;  %v1659_v7 = vpop.f32.mrb[46].mxu0  ;;  %v1712_v14 = vpop.f32.mrb[46].mxu1 }
 0x315   : > { %v1879_v44 = vpack.c.bf16 %v3759_v63, %v3749_v41  ;;  %1980 = vmatprep.subr.bf16.mxu1 %v1884_v45  ;;  %vm1789_vm7 = vcmp.gt.f32.partialorder %v1757_v48, 0.0  ;;  %v1821_v1 = vmul.f32 0.01, %v1757_v48  ;;  %v1760_v12 = vadd.f32 %v3695_v22, %v1710_v61  ;;  %v1661_v36 = vpop.f32.mrb[47].mxu0  ;;  %v1714_v22 = vpop.f32.mrb[47].mxu1 }
 0x316   : > { %v1765_v6 = vadd.f32 %v3705_v4, %v1659_v7  ;;  %v1816_v5 = vmul.f32 0.01, %v3744_v57  ;;  %1981 = vmatpush1.bf16.msra.mxu1 %v1883_v21  ;;  %2894 = vmatmul.mubr.msk.bf16.vlgmr.msra.gmra.mrb[48].mxu0 %vm918_vm4, %v3755_v17  ;;  %vm1791_vm8 = vcmp.gt.f32.partialorder %v1759_v53, 0.0  ;;  %v1823_v18 = vmul.f32 0.01, %v1759_v53 }
 0x317   : > { %vm1790_vm10 = vcmp.gt.f32.partialorder %v1758_v56, 0.0  ;;  %v1853_v23 = vsel %vm1789_vm7, %v1757_v48, %v1821_v1  ;;  %v1822_v9 = vmul.f32 0.01, %v1758_v56  ;;  %vm1792_vm11 = vcmp.gt.f32.partialorder %v1760_v12, 0.0  ;;  %1967 = vmatprep.mubr.bf16.mxu0 %v3112_v0 }
 0x318   : > { %vm1797_vm12 = vcmp.gt.f32.partialorder %v1765_v6, 0.0  ;;  %v1824_v20 = vmul.f32 0.01, %v1760_v12  ;;  %v1829_v25 = vmul.f32 0.01, %v1765_v6  ;;  %v1767_v27 = vadd.f32 %v3705_v4, %v1712_v14 }
 0x319   : > { %v1766_v10 = vadd.f32 %v3705_v4, %v1661_v36  ;;  %2896 = vmatmul.mubr.msk.bf16.vlgmr.msra.gmra.mrb[48].mxu1 %vm918_vm4, %v3755_v17  ;;  %v1855_v26 = vsel %vm1791_vm8, %v1759_v53, %v1823_v18  ;;  %v1768_v8 = vadd.f32 %v3705_v4, %v1714_v22  ;;  %v1838_v11 = vsel %vm1774_vm15, %v3723_v19, %v3733_v42 }
 0x31a   : > { %v1846_v13 = vsel %vm1782_vm5, %v1750_v55, %v1814_v47  ;;  %v1861_v21 = vsel %vm1797_vm12, %v1765_v6, %v1829_v25  ;;  %vm1799_vm13 = vcmp.gt.f32.partialorder %v1767_v27, 0.0  ;;  %v1831_v24 = vmul.f32 0.01, %v1767_v27  ;;  %2020 = vmatprep.mubr.bf16.mxu1 %v3112_v0 }
 0x31b   : > { %vm1798_vm0 = vcmp.gt.f32.partialorder %v1766_v10, 0.0  ;;  %v1885_v31 = vpack.c.bf16 %v1861_v21, %v1853_v23  ;;  %v1830_v32 = vmul.f32 0.01, %v1766_v10  ;;  %vm1800_vm1 = vcmp.gt.f32.partialorder %v1768_v8, 0.0 }
 0x31c   : > { %v1832_v4 = vmul.f32 0.01, %v1768_v8  ;;  %v1863_v33 = vsel %vm1799_vm13, %v1767_v27, %v1831_v24  ;;  %v1878_v35 = vpack.c.bf16 %v1846_v13, %v1838_v11  ;;  %v1840_v19 = vsel %vm1776_vm2, %v3726_v37, %v3738_v46  ;;  %v3814_v37 = vpop.permute.xlu0 %1891  ;;  %v3834_v11 = vpop.permute.xlu1 %1906 }
 0x31d   : > { %v1848_v39 = vsel %vm1784_vm9, %v3744_v57, %v1816_v5  ;;  %v1887_v40 = vpack.c.bf16 %v1863_v33, %v1855_v26  ;;  %v1854_v15 = vsel %vm1790_vm10, %v1758_v56, %v1822_v9  ;;  %v1862_v34 = vsel %vm1798_vm0, %v1766_v10, %v1830_v32 }
 0x31e   : > { %v1880_v43 = vpack.c.bf16 %v1848_v39, %v1840_v19  ;;  %2031 = vmatprep.subr.bf16.mxu0 %v1878_v35  ;;  %2895 = vmatmul.mubr.msk.bf16.gmra.mrb[52].mxu0 %vm918_vm4, %v3013_v30  ;;  %v1886_v28 = vpack.c.bf16 %v1862_v34, %v1854_v15  ;;  %v1856_v42 = vsel %vm1792_vm11, %v1760_v12, %v1824_v20 }
 0x31f   : > { %v1864_v16 = vsel %vm1800_vm1, %v1768_v8, %v1832_v4  ;;  %2032 = vmatpush1.bf16.msra.mxu0 %v1877_v2  ;;  %2063 = vmatprep.mubr.bf16.mxu0 %v3112_v0 }
 0x320   : > { %2084 = vmatprep.subr.bf16.mxu1 %v1880_v43  ;;  %v1888_v49 = vpack.c.bf16 %v1864_v16, %v1856_v42  ;;  %2033 = vmatprep.subr.bf16.mxu0 %v1886_v28  ;;  %v3825_v56 = vpop.permute.xlu0 %1901 }
 0x321   : > { %2085 = vmatpush1.bf16.msra.mxu1 %v1879_v44 }
 0x322   : > { %2897 = vmatmul.mubr.msk.bf16.gmra.mrb[52].mxu1 %vm918_vm4, %v3013_v30  ;;  %2086 = vmatprep.subr.bf16.mxu1 %v1888_v49 }
 0x323   : > { %2116 = vmatprep.mubr.bf16.mxu1 %v3112_v0  ;;  %2034 = vmatpush1.bf16.msra.mxu0 %v1885_v31 }
 0x325   : > { %2087 = vmatpush1.bf16.msra.mxu1 %v1887_v40 }
 0x326   : > { %2898 = vmatmul.mubr.msk.bf16.vlgmr.msra.gmra.mrb[56].mxu0 %vm918_vm4, %v3755_v17 }
 0x327   : > { %2073 = vmatprep.mubr.bf16.mxu0 %v3112_v0 }
 0x32a   : > { %2900 = vmatmul.mubr.msk.bf16.vlgmr.msra.gmra.mrb[56].mxu1 %vm918_vm4, %v3755_v17 }
 0x32b   : > { %2126 = vmatprep.mubr.bf16.mxu1 %v3112_v0 }
 0x32e   : > { %2899 = vmatmul.mubr.msk.bf16.gmra.mrb[60].mxu0 %vm918_vm4, %v3013_v30 }
 0x32f   : > { %2325 = vmatprep.mubr.bf16.mxu0 %v3112_v0 }
 0x332   : > { %2901 = vmatmul.mubr.msk.bf16.gmra.mrb[60].mxu1 %vm918_vm4, %v3013_v30 }
 0x333   : > { %2378 = vmatprep.mubr.bf16.mxu1 %v3112_v0 }
 0x3e9   : > { %v1959_v46 = vpop.f32.mrb[48].mxu0 }
 0x3ea   : > { %v1960_v51 = vadd.f32 %v1959_v46, %v3814_v37  ;;  %v1961_v38 = vpop.f32.mrb[49].mxu0 }
 0x3eb   : > { %v1962_v55 = vadd.f32 %v1961_v38, %v3814_v37  ;;  %v1963_v57 = vpop.f32.mrb[50].mxu0 }
 0x3ec   : > { %v2169_v59 = vmul.f32 0.01, %v1960_v51  ;;  %v2012_v58 = vpop.f32.mrb[48].mxu1  ;;  %v1964_v60 = vadd.f32 %v1963_v57, %v3817_v54  ;;  %v1965_v62 = vpop.f32.mrb[51].mxu0  ;;  %vm2137_vm14 = vcmp.gt.f32.partialorder %v1960_v51, 0.0 }
 0x3ed   : > { %v2013_v29 = vadd.f32 %v2012_v58, %v3814_v37  ;;  %v2014_v41 = vpop.f32.mrb[49].mxu1  ;;  %v1966_v47 = vadd.f32 %v1965_v62, %v3817_v54  ;;  %v2170_v17 = vmul.f32 0.01, %v1962_v55  ;;  %vm2138_vm2 = vcmp.gt.f32.partialorder %v1962_v55, 0.0 }
 0x3ee   : > { %v2015_v50 = vadd.f32 %v2014_v41, %v3814_v37  ;;  %vm2145_vm15 = vcmp.gt.f32.partialorder %v1964_v60, 0.0  ;;  %v2177_v63 = vmul.f32 0.01, %v1964_v60  ;;  %v2016_v45 = vpop.f32.mrb[50].mxu1  ;;  %v2201_v2 = vsel %vm2137_vm14, %v1960_v51, %v2169_v59 }
 0x3ef   : > { %v2171_v48 = vmul.f32 0.01, %v2013_v29  ;;  %v2017_v52 = vadd.f32 %v2016_v45, %v3817_v54  ;;  %vm2146_vm3 = vcmp.gt.f32.partialorder %v1966_v47, 0.0  ;;  %v2018_v3 = vpop.f32.mrb[51].mxu1  ;;  %vm2139_vm6 = vcmp.gt.f32.partialorder %v2013_v29, 0.0 }
 0x3f0   : > { %v2209_v44 = vsel %vm2145_vm15, %v1964_v60, %v2177_v63  ;;  %v2178_v53 = vmul.f32 0.01, %v1966_v47  ;;  %v2172_v61 = vmul.f32 0.01, %v2015_v50  ;;  %v2019_v6 = vadd.f32 %v2018_v3, %v3817_v54 }
 0x3f1   : > { %v2241_v7 = vpack.c.bf16 %v2209_v44, %v2201_v2  ;;  %vm2147_vm5 = vcmp.gt.f32.partialorder %v2017_v52, 0.0  ;;  %v2179_v1 = vmul.f32 0.01, %v2017_v52  ;;  %v1969_v12 = vpop.f32.mrb[52].mxu0  ;;  %v2202_v5 = vsel %vm2138_vm2, %v1962_v55, %v2170_v17 }
 0x3f2   : > { %v1970_v14 = vadd.f32 %v1969_v12, %v3825_v56  ;;  %v1971_v36 = vpop.f32.mrb[53].mxu0  ;;  %v2210_v18 = vsel %vm2146_vm3, %v1966_v47, %v2178_v53  ;;  %v2203_v23 = vsel %vm2139_vm6, %v2013_v29, %v2171_v48  ;;  %vm2140_vm9 = vcmp.gt.f32.partialorder %v2015_v50, 0.0 }
 0x3f3   : > { %v2211_v9 = vsel %vm2147_vm5, %v2017_v52, %v2179_v1  ;;  %v1973_v22 = vpop.f32.mrb[54].mxu0  ;;  %v2242_v20 = vpack.c.bf16 %v2210_v18, %v2202_v5  ;;  %vm2148_vm7 = vcmp.gt.f32.partialorder %v2019_v6, 0.0  ;;  %v2180_v27 = vmul.f32 0.01, %v2019_v6 }
 0x3f4   : > { %v2243_v25 = vpack.c.bf16 %v2211_v9, %v2203_v23  ;;  %v3832_v26 = vadd.f32 %v1971_v36, %v3825_v56  ;;  %v1975_v8 = vpop.f32.mrb[55].mxu0  ;;  %vm2153_vm8 = vcmp.gt.f32.partialorder %v1970_v14, 0.0  ;;  %v2185_v13 = vmul.f32 0.01, %v1970_v14 }
 0x3f5   : > { %v2022_v10 = vpop.f32.mrb[52].mxu1  ;;  %2293 = vmatprep.subr.bf16.mxu0 %v2242_v20  ;;  %v1974_v31 = vadd.f32 %v1973_v22, %v3834_v11  ;;  %v3842_v4 = vadd.f32 %v1975_v8, %v3834_v11  ;;  %v2204_v33 = vsel %vm2140_vm9, %v2015_v50, %v2172_v61  ;;  %v2212_v40 = vsel %vm2148_vm7, %v2019_v6, %v2180_v27 }
 0x3f6   : > { %v2023_v21 = vadd.f32 %v2022_v10, %v3825_v56  ;;  %v2024_v24 = vpop.f32.mrb[53].mxu1  ;;  %2294 = vmatpush1.bf16.msra.mxu0 %v2241_v7  ;;  %v3848_v43 = vsel %vm2153_vm8, %v1970_v14, %v2185_v13  ;;  %vm2154_vm11 = vcmp.gt.f32.partialorder %v3832_v26, 0.0  ;;  %v2186_v15 = vmul.f32 0.01, %v3832_v26 }
 0x3f7   : > { %v3838_v30 = vadd.f32 %v2024_v24, %v3825_v56  ;;  %v2026_v32 = vpop.f32.mrb[54].mxu1  ;;  %vm2161_vm12 = vcmp.gt.f32.partialorder %v1974_v31, 0.0  ;;  %v2193_v34 = vmul.f32 0.01, %v1974_v31  ;;  %vm2162_vm1 = vcmp.gt.f32.partialorder %v3842_v4, 0.0 }
 0x3f8   : > { %vm2155_vm10 = vcmp.gt.f32.partialorder %v2023_v21, 0.0  ;;  %v2187_v35 = vmul.f32 0.01, %v2023_v21  ;;  %v2027_v19 = vadd.f32 %v2026_v32, %v3834_v11  ;;  %v2028_v39 = vpop.f32.mrb[55].mxu1  ;;  %v2244_v38 = vpack.c.bf16 %v2212_v40, %v2204_v33  ;;  %v3911_v40 = vld [vmem:[%s4076_s10] sm:$0xff]  }
 0x3f9   : > { %vm2156_vm13 = vcmp.gt.f32.partialorder %v3838_v30, 0.0  ;;  %v2188_v42 = vmul.f32 0.01, %v3838_v30  ;;  %v2065_v49 = vpop.f32.mrb[56].mxu0  ;;  %v3856_v46 = vsel %vm2161_vm12, %v1974_v31, %v2193_v34  ;;  %v2029_v51 = vadd.f32 %v2028_v39, %v3834_v11 }
 0x3fa   : > { %v3852_v28 = vsel %vm2155_vm10, %v2023_v21, %v2187_v35  ;;  %vm2163_vm0 = vcmp.gt.f32.partialorder %v2027_v19, 0.0  ;;  %v2195_v16 = vmul.f32 0.01, %v2027_v19  ;;  %v2067_v55 = vpop.f32.mrb[57].mxu0  ;;  %v2249_v57 = vpack.c.bf16 %v3856_v46, %v3848_v43  ;;  %2346 = vmatprep.subr.bf16.mxu1 %v2244_v38 }
 0x3fb   : > { %v2066_v58 = vadd.f32 %v2065_v49, %v3814_v37  ;;  %v3866_v60 = vadd.f32 %v2067_v55, %v3814_v37  ;;  %v2069_v62 = vpop.f32.mrb[58].mxu0  ;;  %v2194_v41 = vmul.f32 0.01, %v3842_v4  ;;  %vm2164_vm14 = vcmp.gt.f32.partialorder %v2029_v51, 0.0  ;;  %2347 = vmatpush1.bf16.msra.mxu1 %v2243_v25 }
 0x3fc   : > { %v3862_v59 = vsel %vm2163_vm0, %v2027_v19, %v2195_v16  ;;  %v2070_v17 = vadd.f32 %v2069_v62, %v3817_v54  ;;  %v2071_v50 = vpop.f32.mrb[59].mxu0  ;;  %v2196_v63 = vmul.f32 0.01, %v2029_v51  ;;  %v2218_v27 = vsel %vm2154_vm11, %v3832_v26, %v2186_v15 }
 0x3fd   : > { %v2251_v29 = vpack.c.bf16 %v3862_v59, %v3852_v28  ;;  %v2118_v47 = vpop.f32.mrb[56].mxu1  ;;  %vm2141_vm15 = vcmp.gt.f32.partialorder %v2066_v58, 0.0  ;;  %v2173_v45 = vmul.f32 0.01, %v2066_v58  ;;  %vm2142_vm2 = vcmp.gt.f32.partialorder %v3866_v60, 0.0 }
 0x3fe   : > { %v2119_v48 = vadd.f32 %v2118_v47, %v3814_v37  ;;  %v2120_v52 = vpop.f32.mrb[57].mxu1  ;;  %vm2149_vm3 = vcmp.gt.f32.partialorder %v2070_v17, 0.0  ;;  %v2181_v2 = vmul.f32 0.01, %v2070_v17  ;;  %v2174_v61 = vmul.f32 0.01, %v3866_v60 }
 0x3ff   : > { %v3875_v3 = vadd.f32 %v2120_v52, %v3814_v37  ;;  %v2122_v44 = vpop.f32.mrb[58].mxu1  ;;  %v3879_v12 = vsel %vm2141_vm15, %v2066_v58, %v2173_v45  ;;  %v2072_v14 = vadd.f32 %v2071_v50, %v3817_v54  ;;  %v2226_v10 = vsel %vm2162_vm1, %v3842_v4, %v2194_v41 }
 0x400   : > { %vm2143_vm6 = vcmp.gt.f32.partialorder %v2119_v48, 0.0  ;;  %v2175_v53 = vmul.f32 0.01, %v2119_v48  ;;  %v2123_v7 = vadd.f32 %v2122_v44, %v3817_v54  ;;  %v2124_v1 = vpop.f32.mrb[59].mxu1  ;;  %v3882_v6 = vsel %vm2149_vm3, %v2070_v17, %v2181_v2 }
 0x401   : > { %vm2144_vm5 = vcmp.gt.f32.partialorder %v3875_v3, 0.0  ;;  %v2176_v37 = vmul.f32 0.01, %v3875_v3  ;;  %v2245_v36 = vpack.c.bf16 %v3882_v6, %v3879_v12  ;;  %v2075_v18 = vpop.f32.mrb[60].mxu0  ;;  %vm2150_vm7 = vcmp.gt.f32.partialorder %v2072_v14, 0.0  ;;  %v3968_v12 = vpop.permute.xlu1 %2264 }
 0x402   : > { %vm2151_vm9 = vcmp.gt.f32.partialorder %v2123_v7, 0.0  ;;  %v2183_v5 = vmul.f32 0.01, %v2123_v7  ;;  %v3888_v23 = vsel %vm2143_vm6, %v2119_v48, %v2175_v53  ;;  %v2182_v9 = vmul.f32 0.01, %v2072_v14  ;;  %v2077_v20 = vpop.f32.mrb[61].mxu0 }
 0x403   : > { %v2125_v22 = vadd.f32 %v2124_v1, %v3817_v54  ;;  %v2228_v8 = vsel %vm2164_vm14, %v2029_v51, %v2196_v63  ;;  %v2079_v13 = vpop.f32.mrb[62].mxu0  ;;  %v2250_v24 = vpack.c.bf16 %v2226_v10, %v2218_v27  ;;  %v2220_v54 = vsel %vm2156_vm13, %v3838_v30, %v2188_v42  ;;  %v3015_v48 = vld [vmem:[%s4076_s10 + $0x8] sm:$0xff]   ;;  %v3966_v1 = vpop.permute.xlu0 %2259 }
 0x404   : > { %v3891_v25 = vsel %vm2151_vm9, %v2123_v7, %v2183_v5  ;;  %v2081_v32 = vpop.f32.mrb[63].mxu0  ;;  %v2252_v33 = vpack.c.bf16 %v2228_v8, %v2220_v54  ;;  %v2076_v26 = vadd.f32 %v2075_v18, %v3825_v56  ;;  %v2078_v4 = vadd.f32 %v2077_v20, %v3825_v56 }
 0x405   : > { %v2247_v21 = vpack.c.bf16 %v3891_v25, %v3888_v23  ;;  %vm2152_vm8 = vcmp.gt.f32.partialorder %v2125_v22, 0.0  ;;  %v2128_v31 = vpop.f32.mrb[60].mxu1  ;;  %v2184_v39 = vmul.f32 0.01, %v2125_v22  ;;  %2295 = vmatprep.subr.bf16.mxu0 %v2250_v24  ;;  %v2080_v30 = vadd.f32 %v2079_v13, %v3834_v11 }
 0x406   : > { %v2129_v35 = vadd.f32 %v2128_v31, %v3825_v56  ;;  %v2130_v19 = vpop.f32.mrb[61].mxu1  ;;  %v2082_v42 = vadd.f32 %v2081_v32, %v3834_v11  ;;  %2348 = vmatprep.subr.bf16.mxu1 %v2252_v33  ;;  %2296 = vmatpush1.bf16.msra.mxu0 %v2249_v57  ;;  %vm2157_vm10 = vcmp.gt.f32.partialorder %v2076_v26, 0.0  ;;  %v2189_v16 = vmul.f32 0.01, %v2076_v26 }
 0x407   : > { %v2131_v15 = vadd.f32 %v2130_v19, %v3825_v56  ;;  %v2132_v34 = vpop.f32.mrb[62].mxu1  ;;  %v2206_v49 = vsel %vm2142_vm2, %v3866_v60, %v2174_v61  ;;  %2349 = vmatpush1.bf16.msra.mxu1 %v2251_v29  ;;  %vm2158_vm12 = vcmp.gt.f32.partialorder %v2078_v4, 0.0  ;;  %v2190_v51 = vmul.f32 0.01, %v2078_v4  ;;  %v3978_v32 = vpop.permute.xlu0 %2269 }
 0x408   : > { %vm2159_vm11 = vcmp.gt.f32.partialorder %v2129_v35, 0.0  ;;  %v2191_v56 = vmul.f32 0.01, %v2129_v35  ;;  %v2221_v38 = vsel %vm2157_vm10, %v2076_v26, %v2189_v16  ;;  %vm2165_vm0 = vcmp.gt.f32.partialorder %v2080_v30, 0.0  ;;  %v2134_v46 = vpop.f32.mrb[63].mxu1  ;;  %v3980_v26 = vpop.permute.xlu1 %2274 }
 0x409   : > { %vm2160_vm13 = vcmp.gt.f32.partialorder %v2131_v15, 0.0  ;;  %v2192_v55 = vmul.f32 0.01, %v2131_v15  ;;  %v2197_v43 = vmul.f32 0.01, %v2080_v30  ;;  %2904 = vmatmul.mubr.msk.bf16.vlgmr.msra.gmra.mrb[64].mxu0 %vm918_vm4, %v3911_v40  ;;  %v2133_v57 = vadd.f32 %v2132_v34, %v3834_v11 }
 0x40a   : > { %vm2166_vm1 = vcmp.gt.f32.partialorder %v2082_v42, 0.0  ;;  %v2198_v58 = vmul.f32 0.01, %v2082_v42  ;;  %v2135_v60 = vadd.f32 %v2134_v46, %v3834_v11  ;;  %2906 = vmatmul.mubr.msk.bf16.vlgmr.msra.gmra.mrb[64].mxu1 %vm918_vm4, %v3911_v40  ;;  %v2214_v59 = vsel %vm2150_vm7, %v2072_v14, %v2182_v9  ;;  %2335 = vmatprep.mubr.bf16.mxu0 %v3112_v0 }
 0x40b   : > { %v2229_v28 = vsel %vm2165_vm0, %v2080_v30, %v2197_v43  ;;  %v2208_v62 = vsel %vm2144_vm5, %v3875_v3, %v2176_v37  ;;  %v2216_v29 = vsel %vm2152_vm8, %v2125_v22, %v2184_v39  ;;  %vm2167_vm14 = vcmp.gt.f32.partialorder %v2133_v57, 0.0  ;;  %2388 = vmatprep.mubr.bf16.mxu1 %v3112_v0 }
 0x40c   : > { %v2253_v41 = vpack.c.bf16 %v2229_v28, %v2221_v38  ;;  %v2199_v47 = vmul.f32 0.01, %v2133_v57  ;;  %vm2168_vm15 = vcmp.gt.f32.partialorder %v2135_v60, 0.0  ;;  %v2223_v11 = vsel %vm2159_vm11, %v2129_v35, %v2191_v56 }
 0x40d   : > { %v2200_v17 = vmul.f32 0.01, %v2135_v60  ;;  %v2246_v50 = vpack.c.bf16 %v2214_v59, %v2206_v49  ;;  %v2248_v63 = vpack.c.bf16 %v2216_v29, %v2208_v62  ;;  %v2222_v52 = vsel %vm2158_vm12, %v2078_v4, %v2190_v51  ;;  %v2505_v29 = vld [vmem:[%s4078_s12] sm:$0x3] }
 0x40e   : > { %v2231_v45 = vsel %vm2167_vm14, %v2133_v57, %v2199_v47  ;;  %v2230_v3 = vsel %vm2166_vm1, %v2082_v42, %v2198_v58  ;;  %v2224_v2 = vsel %vm2160_vm13, %v2131_v15, %v2192_v55 }
 0x40f   : > { %v2255_v44 = vpack.c.bf16 %v2231_v45, %v2223_v11  ;;  %2399 = vmatprep.subr.bf16.mxu0 %v2246_v50  ;;  %2452 = vmatprep.subr.bf16.mxu1 %v2248_v63  ;;  %v2254_v53 = vpack.c.bf16 %v2230_v3, %v2222_v52  ;;  %v2232_v61 = vsel %vm2168_vm15, %v2135_v60, %v2200_v17 }
 0x410   : > { %2400 = vmatpush1.bf16.msra.mxu0 %v2245_v36  ;;  %2453 = vmatpush1.bf16.msra.mxu1 %v2247_v21  ;;  %v2256_v7 = vpack.c.bf16 %v2232_v61, %v2224_v2 }
 0x411   : > { %2401 = vmatprep.subr.bf16.mxu0 %v2254_v53  ;;  %2905 = vmatmul.mubr.msk.bf16.gmra.mrb[68].mxu0 %vm918_vm4, %v3015_v48 }
 0x412   : > { %2454 = vmatprep.subr.bf16.mxu1 %v2256_v7  ;;  %2907 = vmatmul.mubr.msk.bf16.gmra.mrb[68].mxu1 %vm918_vm4, %v3015_v48 }
 0x413   : > { %2431 = vmatprep.mubr.bf16.mxu0 %v3112_v0  ;;  %2484 = vmatprep.mubr.bf16.mxu1 %v3112_v0 }
 0x414   : > { %2402 = vmatpush1.bf16.msra.mxu0 %v2253_v41  ;;  %2455 = vmatpush1.bf16.msra.mxu1 %v2255_v44 }
 0x419   : > { %2908 = vmatmul.mubr.msk.bf16.vlgmr.msra.gmra.mrb[72].mxu0 %vm918_vm4, %v3911_v40 }
 0x41a   : > { %2910 = vmatmul.mubr.msk.bf16.vlgmr.msra.gmra.mrb[72].mxu1 %vm918_vm4, %v3911_v40  ;;  %2441 = vmatprep.mubr.bf16.mxu0 %v3112_v0 }
 0x41b   : > { %2494 = vmatprep.mubr.bf16.mxu1 %v3112_v0 }
 0x421   : > { %2909 = vmatmul.mubr.msk.bf16.gmra.mrb[76].mxu0 %vm918_vm4, %v3015_v48 }
 0x422   : > { %2911 = vmatmul.mubr.msk.bf16.gmra.mrb[76].mxu1 %vm918_vm4, %v3015_v48  ;;  %2563 = vmatprep.mubr.bf16.mxu0 %v3112_v0 }
 0x423   : > { %2604 = vmatprep.mubr.bf16.mxu1 %v3112_v0 }
 0x4dc   : > { %v2327_v6 = vpop.f32.mrb[64].mxu0 }
 0x4dd   : > { %v2380_v14 = vpop.f32.mrb[64].mxu1  ;;  %v2329_v37 = vpop.f32.mrb[65].mxu0  ;;  %v2328_v18 = vadd.f32 %v2327_v6, %v3966_v1 }
 0x4de   : > { %v2382_v36 = vpop.f32.mrb[65].mxu1  ;;  %v2331_v5 = vpop.f32.mrb[66].mxu0  ;;  %v2381_v20 = vadd.f32 %v2380_v14, %v3966_v1  ;;  %v2330_v25 = vadd.f32 %v2329_v37, %v3966_v1 }
 0x4df   : > { %v2332_v23 = vadd.f32 %v2331_v5, %v3968_v12  ;;  %v2384_v9 = vpop.f32.mrb[66].mxu1  ;;  %v2333_v22 = vpop.f32.mrb[67].mxu0  ;;  %v2383_v13 = vadd.f32 %v2382_v36, %v3966_v1 }
 0x4e0   : > { %v2385_v27 = vadd.f32 %v2384_v9, %v3968_v12  ;;  %v2334_v10 = vadd.f32 %v2333_v22, %v3968_v12  ;;  %v2386_v8 = vpop.f32.mrb[67].mxu1 }
 0x4e1   : > { %v2507_v21 = vpack.c.bf16 %v2332_v23, %v2328_v18  ;;  %v2387_v24 = vadd.f32 %v2386_v8, %v3968_v12 }
 0x4e2   : > { %v2509_v54 = vpack.c.bf16 %v2385_v27, %v2381_v20  ;;  %v2508_v31 = vpack.c.bf16 %v2334_v10, %v2330_v25 }
 0x4e3   : > { %v2510_v33 = vpack.c.bf16 %v2387_v24, %v2383_v13 }
 0x4e4   : > { %v2337_v35 = vpop.f32.mrb[68].mxu0  ;;  %2531 = vmatprep.subr.bf16.mxu0 %v2508_v31 }
 0x4e5   : > { %v2390_v4 = vpop.f32.mrb[68].mxu1  ;;  %2572 = vmatprep.subr.bf16.mxu1 %v2510_v33  ;;  %v2339_v19 = vpop.f32.mrb[69].mxu0  ;;  %2532 = vmatpush1.bf16.msra.mxu0 %v2507_v21  ;;  %v2338_v15 = vadd.f32 %v2337_v35, %v3978_v32 }
 0x4e6   : > { %v2392_v39 = vpop.f32.mrb[69].mxu1  ;;  %2573 = vmatpush1.bf16.msra.mxu1 %v2509_v54  ;;  %v2341_v40 = vpop.f32.mrb[70].mxu0  ;;  %v2391_v16 = vadd.f32 %v2390_v4, %v3978_v32  ;;  %v2340_v49 = vadd.f32 %v2339_v19, %v3978_v32 }
 0x4e7   : > { %v2342_v30 = vadd.f32 %v2341_v40, %v3980_v26  ;;  %v2394_v34 = vpop.f32.mrb[70].mxu1  ;;  %v2343_v42 = vpop.f32.mrb[71].mxu0  ;;  %v2393_v55 = vadd.f32 %v2392_v39, %v3978_v32 }
 0x4e8   : > { %v2395_v56 = vadd.f32 %v2394_v34, %v3980_v26  ;;  %v2344_v51 = vadd.f32 %v2343_v42, %v3980_v26  ;;  %v2396_v38 = vpop.f32.mrb[71].mxu1  ;;  %v2526_v33 = vpop.permute.xlu0 %2525 }
 0x4e9   : > { %v2515_v43 = vpack.c.bf16 %v2342_v30, %v2338_v15  ;;  %v2397_v46 = vadd.f32 %v2396_v38, %v3980_v26 }
 0x4ea   : > { %v2517_v57 = vpack.c.bf16 %v2395_v56, %v2391_v16  ;;  %v2516_v58 = vpack.c.bf16 %v2344_v51, %v2340_v49 }
 0x4eb   : > { %v2518_v60 = vpack.c.bf16 %v2397_v46, %v2393_v55 }
 0x4ec   : > { %v2433_v28 = vpop.f32.mrb[72].mxu0  ;;  %2533 = vmatprep.subr.bf16.mxu0 %v2516_v58 }
 0x4ed   : > { %v2486_v59 = vpop.f32.mrb[72].mxu1  ;;  %2574 = vmatprep.subr.bf16.mxu1 %v2518_v60  ;;  %v2435_v62 = vpop.f32.mrb[73].mxu0  ;;  %2534 = vmatpush1.bf16.msra.mxu0 %v2515_v43  ;;  %v2434_v11 = vadd.f32 %v2433_v28, %v3966_v1 }
 0x4ee   : > { %v2488_v41 = vpop.f32.mrb[73].mxu1  ;;  %2575 = vmatpush1.bf16.msra.mxu1 %v2517_v57  ;;  %v2437_v47 = vpop.f32.mrb[74].mxu0  ;;  %v2487_v45 = vadd.f32 %v2486_v59, %v3966_v1  ;;  %v2436_v48 = vadd.f32 %v2435_v62, %v3966_v1 }
 0x4ef   : > { %v2438_v17 = vadd.f32 %v2437_v47, %v3968_v12  ;;  %v2490_v50 = vpop.f32.mrb[74].mxu1  ;;  %v2439_v63 = vpop.f32.mrb[75].mxu0  ;;  %v2489_v44 = vadd.f32 %v2488_v41, %v3966_v1 }
 0x4f0   : > { %v2491_v52 = vadd.f32 %v2490_v50, %v3968_v12  ;;  %v2440_v3 = vadd.f32 %v2439_v63, %v3968_v12  ;;  %v2492_v2 = vpop.f32.mrb[75].mxu1  ;;  %2912 = vmatmul.mubr.msk.bf16.vlgmr.msra.gmra.mrb[80].mxu0 %vm918_vm4, %v2505_v29 }
 0x4f1   : > { %v2511_v53 = vpack.c.bf16 %v2438_v17, %v2434_v11  ;;  %v2493_v61 = vadd.f32 %v2492_v2, %v3968_v12  ;;  %2913 = vmatmul.mubr.msk.bf16.vlgmr.msra.gmra.mrb[80].mxu1 %vm918_vm4, %v2505_v29  ;;  %2645 = vmatprep.mubr.bf16.mxu0 %v3112_v0 }
 0x4f2   : > { %v2513_v7 = vpack.c.bf16 %v2491_v52, %v2487_v45  ;;  %v2512_v6 = vpack.c.bf16 %v2440_v3, %v2436_v48  ;;  %2686 = vmatprep.mubr.bf16.mxu1 %v3112_v0 }
 0x4f3   : > { %v2514_v14 = vpack.c.bf16 %v2493_v61, %v2489_v44 }
 0x4f4   : > { %v2443_v37 = vpop.f32.mrb[76].mxu0  ;;  %2613 = vmatprep.subr.bf16.mxu0 %v2512_v6 }
 0x4f5   : > { %v2496_v36 = vpop.f32.mrb[76].mxu1  ;;  %2654 = vmatprep.subr.bf16.mxu1 %v2514_v14  ;;  %v2445_v5 = vpop.f32.mrb[77].mxu0  ;;  %2614 = vmatpush1.bf16.msra.mxu0 %v2511_v53  ;;  %v2444_v12 = vadd.f32 %v2443_v37, %v3978_v32 }
 0x4f6   : > { %v2498_v18 = vpop.f32.mrb[77].mxu1  ;;  %2655 = vmatpush1.bf16.msra.mxu1 %v2513_v7  ;;  %v2447_v1 = vpop.f32.mrb[78].mxu0  ;;  %v2497_v20 = vadd.f32 %v2496_v36, %v3978_v32  ;;  %v2446_v0 = vadd.f32 %v2445_v5, %v3978_v32 }
 0x4f7   : > { %v2448_v23 = vadd.f32 %v2447_v1, %v3980_v26  ;;  %v2500_v9 = vpop.f32.mrb[78].mxu1  ;;  %v2449_v22 = vpop.f32.mrb[79].mxu0  ;;  %v2499_v8 = vadd.f32 %v2498_v18, %v3978_v32 }
 0x4f8   : > { %v2501_v25 = vadd.f32 %v2500_v9, %v3980_v26  ;;  %v2450_v27 = vadd.f32 %v2449_v22, %v3980_v26  ;;  %v2502_v10 = vpop.f32.mrb[79].mxu1 }
 0x4f9   : > { %v2519_v13 = vpack.c.bf16 %v2448_v23, %v2444_v12  ;;  %v2503_v21 = vadd.f32 %v2502_v10, %v3980_v26 }
 0x4fa   : > { %v2521_v24 = vpack.c.bf16 %v2501_v25, %v2497_v20  ;;  %v2520_v54 = vpack.c.bf16 %v2450_v27, %v2446_v0 }
 0x4fb   : > { %v2522_v31 = vpack.c.bf16 %v2503_v21, %v2499_v8 }
 0x4fc   : > { %2615 = vmatprep.subr.bf16.mxu0 %v2520_v54 }
 0x4fd   : > { %2656 = vmatprep.subr.bf16.mxu1 %v2522_v31  ;;  %2616 = vmatpush1.bf16.msra.mxu0 %v2519_v13 }
 0x4fe   : > { %2657 = vmatpush1.bf16.msra.mxu1 %v2521_v24 }
 0x500   : > { %2914 = vmatmul.mubr.msk.bf16.vlgmr.msra.gmra.mrb[84].mxu0 %vm918_vm4, %v2505_v29 }
 0x501   : > { %2915 = vmatmul.mubr.msk.bf16.vlgmr.msra.gmra.mrb[84].mxu1 %vm918_vm4, %v2505_v29 }
 0x5c3   : > { %v2565_v35 = vpop.f32.mrb[80].mxu0 }
 0x5c4   : > { %v2566_v4 = vadd.f32 %v2565_v35, %v2526_v33  ;;  %v2606_v19 = vpop.f32.mrb[80].mxu1  ;;  %v2567_v39 = vpop.f32.mrb[81].mxu0 }
 0x5c5   : > { %v2607_v32 = vadd.f32 %v2606_v19, %v2526_v33  ;;  %v2568_v40 = vadd.f32 %v2567_v39, %v2526_v33  ;;  %v2608_v15 = vpop.f32.mrb[81].mxu1  ;;  %v2569_v26 = vpop.f32.mrb[82].mxu0 }
 0x5c6   : > { %v2916_v30 = vmul.f32 -1.442695, %v2566_v4  ;;  %v2609_v34 = vadd.f32 %v2608_v15, %v2526_v33  ;;  %v2610_v42 = vpop.f32.mrb[82].mxu1  ;;  %v2570_v16 = vpop.f32.mrb[83].mxu0 }
 0x5c7   : > { %v2918_v49 = vmul.f32 -1.442695, %v2607_v32  ;;  %v2917_v56 = vmul.f32 -1.442695, %v2568_v40  ;;  %v2611_v51 = vpop.f32.mrb[83].mxu1 }
 0x5c8   : > { %3016 = vpow2.f32 %v2916_v30  ;;  %v2919_v38 = vmul.f32 -1.442695, %v2609_v34 }
 0x5c9   : > { %3018 = vpow2.f32 %v2918_v49 }
 0x5ca   : > { %3020 = vpow2.f32 %v2917_v56 }
 0x5cb   : > { %3022 = vpow2.f32 %v2919_v38 }
 0x5d2   : > { %v3017_v55 = vpop.eup %3016 }
 0x5d3   : > { %v3019_v43 = vpop.eup %3018  ;;  %v2719_v46 = vadd.f32 1.0, %v3017_v55  ;;  %v2647_v57 = vpop.f32.mrb[84].mxu0 }
 0x5d4   : > { %v3021_v58 = vpop.eup %3020  ;;  %v2721_v60 = vadd.f32 1.0, %v3019_v43  ;;  %v2648_v28 = vadd.f32 %v2647_v57, %v2526_v33  ;;  %v2688_v59 = vpop.f32.mrb[84].mxu1 }
 0x5d5   : > { %v2649_v62 = vpop.f32.mrb[85].mxu0  ;;  %v3023_v29 = vpop.eup %3022  ;;  %3024 = vrcp.f32 %v2719_v46  ;;  %v2720_v41 = vadd.f32 1.0, %v3021_v58  ;;  %v2689_v47 = vadd.f32 %v2688_v59, %v2526_v33 }
 0x5d6   : > { %v2650_v11 = vadd.f32 %v2649_v62, %v2526_v33  ;;  %v2690_v17 = vpop.f32.mrb[85].mxu1  ;;  %v2651_v50 = vpop.f32.mrb[86].mxu0  ;;  %3026 = vrcp.f32 %v2721_v60  ;;  %v2722_v63 = vadd.f32 1.0, %v3023_v29  ;;  %v2920_v45 = vmul.f32 -1.442695, %v2648_v28 }
 0x5d7   : > { %v2691_v48 = vadd.f32 %v2690_v17, %v2526_v33  ;;  %v2692_v52 = vpop.f32.mrb[86].mxu1  ;;  %v2652_v3 = vpop.f32.mrb[87].mxu0  ;;  %3028 = vrcp.f32 %v2720_v41  ;;  %v2922_v2 = vmul.f32 -1.442695, %v2689_v47 }
 0x5d8   : > { %v2921_v44 = vmul.f32 -1.442695, %v2650_v11  ;;  %v2693_v53 = vpop.f32.mrb[87].mxu1  ;;  %3030 = vrcp.f32 %v2722_v63 }
 0x5d9   : > { %v2923_v61 = vmul.f32 -1.442695, %v2691_v48  ;;  %3032 = vpow2.f32 %v2920_v45 }
 0x5da   : > { %3034 = vpow2.f32 %v2922_v2 }
 0x5db   : > { %3036 = vpow2.f32 %v2921_v44 }
 0x5dc   : > { %3038 = vpow2.f32 %v2923_v61 }
 0x5df   : > { %v3025_v7 = vpop.eup %3024 }
 0x5e0   : > { %v3027_v6 = vpop.eup %3026 }
 0x5e1   : > { %v3029_v14 = vpop.eup %3028 }
 0x5e2   : > { %v3031_v37 = vpop.eup %3030  ;;  %v2751_v36 = vcombine.low %v3025_v7, %v3029_v14 }
 0x5e3   : > { %v3033_v5 = vpop.eup %3032  ;;  %v2752_v18 = vcombine.low %v3027_v6, %v3031_v37 }
 0x5e4   : > { %v3035_v1 = vpop.eup %3034  ;;  %v2723_v12 = vadd.f32 1.0, %v3033_v5  ;;  %2759 = vst [vmem:[%s461_s18] sm:$0xff] %v2751_v36 }
 0x5e5   : > { %v3037_v23 = vpop.eup %3036  ;;  %v2725_v9 = vadd.f32 1.0, %v3035_v1  ;;  %2760 = vst [vmem:[%s461_s18 + $0x8] sm:$0xff] %v2752_v18 }
 0x5e6   : > { %v3039_v22 = vpop.eup %3038  ;;  %3040 = vrcp.f32 %v2723_v12  ;;  %v2724_v20 = vadd.f32 1.0, %v3037_v23 }
 0x5e7   : > { %3042 = vrcp.f32 %v2725_v9  ;;  %v2726_v0 = vadd.f32 1.0, %v3039_v22 }
 0x5e8   : > { %3044 = vrcp.f32 %v2724_v20 }
 0x5e9   : > { %3046 = vrcp.f32 %v2726_v0 }
 0x5f0   : > { %v3041_v25 = vpop.eup %3040 }
 0x5f1   : > { %v3043_v27 = vpop.eup %3042 }
 0x5f2   : > { %v3045_v10 = vpop.eup %3044 }
 0x5f3   : > { %v3047_v8 = vpop.eup %3046  ;;  %v2753_v13 = vcombine.low %v3041_v25, %v3045_v10 }
 0x5f4   : > { %v2754_v21 = vcombine.low %v3043_v27, %v3047_v8 }
 0x5f5   : > { %2761 = vst [vmem:[%s461_s18 + $0x10] sm:$0xff] %v2753_v13 }
 0x5f6   : > { %2762 = vst [vmem:[%s461_s18 + $0x18] sm:$0xff] %v2754_v21 }
 0x5f7   : > { %3061 = shalt.err (!%p3058_p3)
}
 0x5f8   : > { %s3062_s24 = scalar_lea.hbm %s4022_s29, 512  ;;  %s3066_s18 = scalar_lea.hbm %s4080_s14, 1024 }
 0x5f9   : > { %p3063_p4 = scmp.ne.s32.totalorder %s4022_s29, %s3062_s24  ;;  %p3067_p9 = scmp.lt.u32.totalorder %s4022_s29, %s4080_s14 }
 0x5fa   : > { %p3068_p10 = scmp.lt.u32.totalorder %s3066_s18, %s3062_s24  ;;  %p3070_p12 = scmp.lt.u32.totalorder %s3062_s24, %s4022_s29 }
 0x5fb   : > { %p3064_p7 = pnand %p3063_p4, %p3227_p5 }
 0x5fc   : > { %p3069_p11 = por %p3068_p10, %p3067_p9 }
 0x5fd   : > { %p3065_p8 = pneg %p3064_p7 }
 0x5fe   : > { %p3071_p13 = por %p3070_p12, %p3069_p11 }
 0x600   : > { %p3072_p0 = pnand %p3071_p13, %p3065_p8 }
 0x602   : > { %3075 = shalt.err (!%p3072_p0)
}
 0x603   : > { %2962 = dma.vmem_to_hbm [thread:$0]  (%p3227_p5), %s4024_s21, 512, %s4022_s29, %s2764_s15  }
 0x604 PF: > { %s4095_s27 = sld [smem:[#allocation7_spill]]  ;;  %s4096_s17 = sld [smem:[#allocation5_spill]] }
 0x60a   : > { %p2968_p1 = scmp.ge.s32.totalorder %s4095_s27, 2  ;;  %s2790_s19 = sand.u32 1, %s4096_s17  }
 0x60b   : > { %s2791_s22 = scalar_lea.sflag [#allocation3], %s2790_s19 }
 0x60c   : > { %p2965_p2 = pnand %p2968_p1, %p3231_p6 }
 0x60e   : > { %3093 = dma.done.wait (!%p2965_p2), %s2791_s22, 512  }
 0x60f   : > { %3095 = vsyncadd (!%p2965_p2), %s2791_s22, 4294966784  ;;  %s4098_s16 = sld [smem:[#allocation8_spill]]  ;;  %s4099_s24 = sld [smem:[#allocation6_spill]] }
 0x610   : > { %s4100_s15 = sld [smem:[#allocation9_spill]]  ;;  %s4101_s29 = smov %s3102_s30 }
 0x615   : > { %p24_p3 = scmp.ge.s32.totalorder %s4098_s16, 4   ;;  %s4102_s30 = smov %s4099_s24 }
 0x617   :  { %26 = sbr.rel (!%p24_p3) target bundleno = 3 (0x3), region = 111 }
 0x61e   :  { %2796 = vsyncpa [#allocation3], 1 }
 0x61f   :  { %2798 = vsyncpa [#allocation3 + $0x1], 1 }

</bundles_post_ra>
